<compile_context>
chip_gen: v7x
topology: tpu7x:2x2x1
jax: 0.10.0
libtpu: 0.0.40
codegen_flags: <defaults>
</compile_context>

<pallas_src>
import math
import functools

import jax
import jax.numpy as jnp
from jax import lax
from jax.experimental import pallas as pl
from jax.experimental.pallas import tpu as pltpu

try:
    _CompilerParams = pltpu.CompilerParams
except AttributeError:                      # older JAX naming
    _CompilerParams = pltpu.TPUCompilerParams


def _recip(x):
    # EUP reciprocal when available; exact divide otherwise.
    if hasattr(pl, "reciprocal"):
        return pl.reciprocal(x, approx=True)
    return 1.0 / x


def _erf(x):
    # Abramowitz & Stegun 7.1.26, |error| <= 1.5e-7 — avoids relying on a
    # lax.erf lowering; uses only exp / mul / add / where (VPU + EUP).
    a1, a2, a3, a4, a5 = 0.254829592, -0.284496736, 1.421413741, -1.453152027, 1.061405429
    p = 0.3275911
    ax = jnp.abs(x)
    t = 1.0 / (1.0 + p * ax)
    poly = ((((a5 * t + a4) * t + a3) * t + a2) * t + a1) * t
    y = 1.0 - poly * jnp.exp(-ax * ax)
    return jnp.where(x >= 0, y, -y)


def _gelu_exact(x):
    return 0.5 * x * (1.0 + _erf(x * 0.7071067811865476))


# ---------------------------------------------------------------------------
# Tiling helper
# ---------------------------------------------------------------------------

def _row_tile(M):
    """Row tile: multiple of 8, <=512 rows, and >=2 grid steps when possible
    (v7x megacore)."""
    if M < 16:
        return M
    for t in (512, 256, 128, 64, 32, 16, 8):
        if M % t == 0 and 2 * t <= M:
            return t
    return M  # TODO(synk): pad ragged M to a multiple of 8 at production sizes.


# ---------------------------------------------------------------------------
# Pallas kernels
# ---------------------------------------------------------------------------

def _matmul_bias_act_kernel(a_ref, w_ref, b_ref, o_ref, *, activation):
    acc = jnp.dot(a_ref[...].astype(jnp.bfloat16), w_ref[...],
                  preferred_element_type=jnp.float32)
    acc = acc + b_ref[...]
    if activation == "relu":
        acc = jnp.maximum(acc, 0.0)
    o_ref[...] = acc.astype(o_ref.dtype)


def pallas_linear(a, w, b, activation="none", out_dtype=jnp.float32):
    """(M, K) @ (K, N) + (1, N), optional fused activation, selectable out dtype."""
    M, K = a.shape
    N = w.shape[1]
    TM = _row_tile(M)
    kern = functools.partial(_matmul_bias_act_kernel, activation=activation)
    return pl.pallas_call(
        kern,
        out_shape=jax.ShapeDtypeStruct((M, N), out_dtype),
        grid=(M // TM,),
        in_specs=[
            pl.BlockSpec((TM, K), lambda i: (i, 0)),
            pl.BlockSpec((K, N), lambda i: (0, 0)),
            pl.BlockSpec((1, N), lambda i: (0, 0)),
        ],
        out_specs=pl.BlockSpec((TM, N), lambda i: (i, 0)),
        compiler_params=_CompilerParams(dimension_semantics=("parallel",)),
    )(a, w, b)


def _attention_kernel(qkv_ref, o_ref, *, nhead):
    # One batch element per grid step.  Scale is pre-folded into the Q weights.
    L, threeD = qkv_ref.shape
    D = threeD // 3
    Dh = D // nhead
    qkv = qkv_ref[...]                                    # (L, 3D) bf16
    outs = []
    for h in range(nhead):                                # static unroll over heads
        q = qkv[:, h * Dh:(h + 1) * Dh]
        k = qkv[:, D + h * Dh:D + (h + 1) * Dh]
        v = qkv[:, 2 * D + h * Dh:2 * D + (h + 1) * Dh]
        s = lax.dot_general(q, k, (((1,), (1,)), ((), ())),
                            preferred_element_type=jnp.float32)      # (L, L)
        m = jnp.max(s, axis=-1, keepdims=True)
        p = jnp.exp(s - m)
        denom = jnp.sum(p, axis=-1, keepdims=True)
        o = jnp.dot(p.astype(jnp.bfloat16), v,
                    preferred_element_type=jnp.float32)              # (L, Dh)
        o = o * _recip(denom)              # normalize AFTER PV: O(L*Dh) not O(L*L)
        outs.append(o)
    # merged-head, lane-dense (L, D) output -> feeds out-proj with no transpose
    o_ref[...] = jnp.concatenate(outs, axis=-1).astype(o_ref.dtype)
    # TODO(synk): KV-tile (flash-style) + per-head grid axis at production L.


def pallas_attention(qkv, *, B, L, nhead):
    """qkv: (B*L, 3D) fused projection; returns merged-head (B*L, D) bf16."""
    BL, threeD = qkv.shape
    D = threeD // 3
    kern = functools.partial(_attention_kernel, nhead=nhead)
    return pl.pallas_call(
        kern,
        out_shape=jax.ShapeDtypeStruct((BL, D), jnp.bfloat16),
        grid=(B,),
        in_specs=[pl.BlockSpec((L, threeD), lambda b: (b, 0))],
        out_specs=pl.BlockSpec((L, D), lambda b: (b, 0)),
        compiler_params=_CompilerParams(dimension_semantics=("parallel",)),
    )(qkv)


def _outproj_add_ln_kernel(attn_ref, x_ref, wo_ref, bo_ref, g_ref, b_ref, o_ref,
                           *, eps):
    y = jnp.dot(attn_ref[...], wo_ref[...],
                preferred_element_type=jnp.float32) + bo_ref[...]
    z = x_ref[...] + y                                     # residual add (f32)
    mean = jnp.mean(z, axis=-1, keepdims=True)
    var = jnp.mean((z - mean) ** 2, axis=-1, keepdims=True)
    o_ref[...] = ((z - mean) * lax.rsqrt(var + eps) * g_ref[...]
                  + b_ref[...]).astype(o_ref.dtype)


def pallas_outproj_add_ln(attn, x, wo, bo, g, b, eps=1e-5):
    M, D = x.shape
    TM = _row_tile(M)
    kern = functools.partial(_outproj_add_ln_kernel, eps=eps)
    row = pl.BlockSpec((TM, D), lambda i: (i, 0))

    def full(arr):
        return pl.BlockSpec(arr.shape, lambda i: (0, 0))

    return pl.pallas_call(
        kern,
        out_shape=jax.ShapeDtypeStruct((M, D), jnp.float32),
        grid=(M // TM,),
        in_specs=[row, row, full(wo), full(bo), full(g), full(b)],
        out_specs=row,
        compiler_params=_CompilerParams(dimension_semantics=("parallel",)),
    )(attn, x, wo, bo, g, b)


def _ffn_add_ln_kernel(x_ref, w1_ref, b1_ref, w2_ref, b2_ref, g_ref, b_ref,
                       o_ref, *, eps):
    x = x_ref[...]
    h = jnp.dot(x.astype(jnp.bfloat16), w1_ref[...],
                preferred_element_type=jnp.float32) + b1_ref[...]
    h = _gelu_exact(h)                       # torch F.gelu default (exact erf)
    y = jnp.dot(h.astype(jnp.bfloat16), w2_ref[...],
                preferred_element_type=jnp.float32) + b2_ref[...]
    z = x + y                                              # residual add (f32)
    mean = jnp.mean(z, axis=-1, keepdims=True)
    var = jnp.mean((z - mean) ** 2, axis=-1, keepdims=True)
    o_ref[...] = ((z - mean) * lax.rsqrt(var + eps) * g_ref[...]
                  + b_ref[...]).astype(o_ref.dtype)
    # TODO(synk): at FF=2048+ on v7x, K-tile the FFN weights (accumulator
    # scratch) or use pipeline_mode=pl.Buffered(1) on the constant weight specs.


def pallas_ffn_add_ln(x, w1, b1, w2, b2, g, b, eps=1e-5):
    M, D = x.shape
    TM = _row_tile(M)
    kern = functools.partial(_ffn_add_ln_kernel, eps=eps)
    row = pl.BlockSpec((TM, D), lambda i: (i, 0))

    def full(arr):
        return pl.BlockSpec(arr.shape, lambda i: (0, 0))

    return pl.pallas_call(
        kern,
        out_shape=jax.ShapeDtypeStruct((M, D), jnp.float32),
        grid=(M // TM,),
        in_specs=[row, full(w1), full(b1), full(w2), full(b2), full(g), full(b)],
        out_specs=row,
        compiler_params=_CompilerParams(dimension_semantics=("parallel",)),
    )(x, w1, b1, w2, b2, g, b)


def _conv1d_kernel(*refs, k, activation, has_add, transpose_out):
    if has_add:
        x_ref, w_ref, b_ref, add_ref, o_ref = refs
    else:
        x_ref, w_ref, b_ref, o_ref = refs
        add_ref = None
    L = o_ref.shape[2] if transpose_out else o_ref.shape[1]
    x = x_ref[0]                                           # (Lp, Cin)
    # unfold the k taps into lanes -> one wide matmul instead of k skinny ones
    xu = jnp.concatenate([x[j:j + L, :] for j in range(k)], axis=-1)
    xu = xu.astype(jnp.bfloat16)                           # (L, k*Cin)
    if transpose_out:
        # w: (Cout, k*Cin), b: (Cout, 1)  ->  (Cout, L) lane-dense output
        acc = lax.dot_general(w_ref[...], xu, (((1,), (1,)), ((), ())),
                              preferred_element_type=jnp.float32)
        acc = acc + b_ref[...]
    else:
        acc = jnp.dot(xu, w_ref[...], preferred_element_type=jnp.float32)
        acc = acc + b_ref[...]
        if has_add:
            acc = acc + add_ref[...]                       # fused PE add
    if activation == "relu":
        acc = jnp.maximum(acc, 0.0)
    o_ref[0] = acc.astype(o_ref.dtype)
    # TODO(synk): for the Cin=1 embedding conv, lay L on the lane axis at
    # production lengths to avoid 1-lane vreg occupancy.


def conv1d_nlc(x, w, b, *, k, pad, activation="none", add=None,
               transpose_out=False):
    """Conv1d in (B, L, C) layout.

    w: (k*Cin, Cout) bf16 (BatchNorm pre-folded) — or (Cout, k*Cin) with
    b: (Cout, 1) when transpose_out=True, in which case the kernel writes the
    lane-dense (B, Cout, L) layout directly.  `add` (L, Cout) is fused into the
    epilogue (positional encoding).
    """
    B, L, Cin = x.shape
    Cout = w.shape[0] if transpose_out else w.shape[1]
    Lp = L + 2 * pad
    xp = jnp.pad(x, ((0, 0), (pad, pad), (0, 0)))
    in_specs = [
        pl.BlockSpec((1, Lp, Cin), lambda i: (i, 0, 0)),
        pl.BlockSpec(w.shape, lambda i: (0, 0)),
        pl.BlockSpec(b.shape, lambda i: (0, 0)),
    ]
    args = [xp, w, b]
    if add is not None:
        in_specs.append(pl.BlockSpec(add.shape, lambda i: (0, 0)))
        args.append(add)
    kern = functools.partial(_conv1d_kernel, k=k, activation=activation,
                             has_add=add is not None, transpose_out=transpose_out)
    out_shape = (B, Cout, L) if transpose_out else (B, L, Cout)
    out_block = (1, Cout, L) if transpose_out else (1, L, Cout)
    return pl.pallas_call(
        kern,
        out_shape=jax.ShapeDtypeStruct(out_shape, jnp.float32),
        grid=(B,),
        in_specs=in_specs,
        out_specs=pl.BlockSpec(out_block, lambda i: (i, 0, 0)),
        compiler_params=_CompilerParams(dimension_semantics=("parallel",)),
    )(*args)


def conv_transpose1d_nlc(x, w, b_rep, k, activation="none"):
    """ConvTranspose1d with kernel_size == stride == k (non-overlapping).

    x: (B, L, Cin); w: (Cin, k*Cout) bf16 with k-MAJOR columns (BN folded);
    b_rep: (1, k*Cout).  Because the columns are k-major, the un-interleave is
    a pure reshape (no transpose).  ReLU/BN commute with the rearrangement.
    """
    B, L, Cin = x.shape
    Cout = w.shape[1] // k
    out = pallas_linear(x.reshape(B * L, Cin), w, b_rep, activation=activation)
    return out.reshape(B, L * k, Cout)


# ---------------------------------------------------------------------------
# Model forward
# ---------------------------------------------------------------------------

def transformer_encoder_layer(xf, p, nhead, B, L):
    # Post-norm nn.TransformerEncoderLayer (batch_first, activation='gelu'),
    # dropout identity in eval mode.  xf: (B*L, D) f32 residual stream.
    qkv = pallas_linear(xf, p["wqkv"], p["bqkv"], out_dtype=jnp.bfloat16)  # (B*L, 3D)
    attn = pallas_attention(qkv, B=B, L=L, nhead=nhead)                    # (B*L, D) bf16
    x1 = pallas_outproj_add_ln(attn, xf, p["wo"], p["bo"], p["ln1_g"], p["ln1_b"])
    x2 = pallas_ffn_add_ln(x1, p["w_ff1"], p["b_ff1"], p["w_ff2"], p["b_ff2"],
                           p["ln2_g"], p["ln2_b"])
    return x2


def signal_decomposition_transformer(x, params, cfg):
    B, L, _ = x.shape
    dm = cfg["d_model"]

    # input_embed: conv(+relu), conv(+BN folded, +positional encoding fused)
    h = conv1d_nlc(x, params["emb_w1"], params["emb_b1"], k=3, pad=1,
                   activation="relu")
    h = conv1d_nlc(h, params["emb_w2"], params["emb_b2"], k=3, pad=1,
                   add=params["pe"][:L])

    # transformer encoder, flat (B*L, D) residual stream
    hf = h.reshape(B * L, dm)
    for lp in params["layers"]:
        hf = transformer_encoder_layer(hf, lp, cfg["nhead"], B, L)
    h = hf.reshape(B, L, dm)

    # upsample (ConvTranspose + BN + ReLU, Conv k=5 + BN + ReLU — BN folded)
    if cfg["upsampled_len"] > cfg["seq_len"]:
        up = cfg["upsampled_len"] // cfg["seq_len"]
        h = conv_transpose1d_nlc(h, params["up_wt"], params["up_bt"], up,
                                 activation="relu")
        h = conv1d_nlc(h, params["up_w2"], params["up_b2"], k=5, pad=2,
                       activation="relu")

    # proj: conv+relu, then final conv written directly as (B, Cout, L_up)
    h = conv1d_nlc(h, params["proj_w1"], params["proj_b1"], k=3, pad=1,
                   activation="relu")
    out = conv1d_nlc(h, params["proj_w2"], params["proj_b2"], k=3, pad=1,
                     transpose_out=True)
    return out                              # (B, out_channels, upsampled_len)


# ---------------------------------------------------------------------------
# Parameters: synthetic init + one-time preparation (folding / fusion / bf16)
# ---------------------------------------------------------------------------

def sinusoidal_pe(max_len, d_model):
    pos = jnp.arange(max_len, dtype=jnp.float32)[:, None]
    div = jnp.exp(jnp.arange(0, d_model, 2, dtype=jnp.float32)
                  * (-math.log(10000.0) / d_model))
    pe = jnp.zeros((max_len, d_model), jnp.float32)
    pe = pe.at[:, 0::2].set(jnp.sin(pos * div))
    pe = pe.at[:, 1::2].set(jnp.cos(pos * div))
    return pe


def init_params(key, cfg):
    dm, ff = cfg["d_model"], cfg["dim_feedforward"]
    c_in, c_out = cfg["in_channels"], cfg["out_channels"]
    d2 = dm // 2
    up = cfg["upsampled_len"] // cfg["seq_len"]
    keys = iter(jax.random.split(key, 256))

    def w(shape, scale=0.05):
        return jax.random.normal(next(keys), shape, jnp.float32) * scale

    raw = dict(
        emb_w1=w((3, c_in, d2)), emb_b1=w((d2,)),
        emb_w2=w((3, d2, dm)), emb_b2=w((dm,)),
        emb_bn_g=jnp.ones((dm,), jnp.float32) + w((dm,), 0.01),
        emb_bn_b=w((dm,), 0.01),
        pe=sinusoidal_pe(cfg["seq_len"], dm),
        up_wt=w((dm, dm, up)), up_bt=w((dm,)),
        up_bn1_g=jnp.ones((dm,), jnp.float32) + w((dm,), 0.01),
        up_bn1_b=w((dm,), 0.01),
        up_w2=w((5, dm, dm)), up_b2=w((dm,)),
        up_bn2_g=jnp.ones((dm,), jnp.float32) + w((dm,), 0.01),
        up_bn2_b=w((dm,), 0.01),
        proj_w1=w((3, dm, d2)), proj_b1=w((d2,)),
        proj_w2=w((3, d2, c_out)), proj_b2=w((c_out,)),
        layers=[],
    )
    for _ in range(cfg["num_layers"]):
        raw["layers"].append(dict(
            wq=w((dm, dm)), bq=w((dm,)),
            wk=w((dm, dm)), bk=w((dm,)),
            wv=w((dm, dm)), bv=w((dm,)),
            wo=w((dm, dm)), bo=w((dm,)),
            ln1_g=jnp.ones((dm,), jnp.float32), ln1_b=jnp.zeros((dm,), jnp.float32),
            ln2_g=jnp.ones((dm,), jnp.float32), ln2_b=jnp.zeros((dm,), jnp.float32),
            w_ff1=w((dm, ff)), b_ff1=w((ff,)),
            w_ff2=w((ff, dm)), b_ff2=w((dm,)),
        ))
    return raw


def prepare_params(raw, cfg, eps=1e-5):
    """One-time prep: fold eval-mode BN into conv weights, fuse QKV (with the
    attention scale folded into the Q columns), reorder ConvTranspose columns
    k-major, pre-transpose the final conv weight, cast matmul weights to bf16
    and hoist bias reshapes out of the forward path."""
    bf = jnp.bfloat16
    dm = cfg["d_model"]
    up = cfg["upsampled_len"] // cfg["seq_len"]

    def bn_scale_shift(gamma, beta):
        # eval-mode BN with running_mean=0, running_var=1 (fresh module)
        scale = gamma * lax.rsqrt(jnp.ones_like(gamma) + eps)
        return scale, beta

    def conv_w(wk):                      # (k, Cin, Cout) -> (k*Cin, Cout) bf16
        k, ci, co = wk.shape
        return wk.reshape(k * ci, co).astype(bf)

    p = {}
    # input_embed
    p["emb_w1"] = conv_w(raw["emb_w1"])
    p["emb_b1"] = raw["emb_b1"].reshape(1, -1)
    s, t = bn_scale_shift(raw["emb_bn_g"], raw["emb_bn_b"])
    p["emb_w2"] = conv_w(raw["emb_w2"] * s[None, None, :])
    p["emb_b2"] = (raw["emb_b2"] * s + t).reshape(1, -1)
    p["pe"] = raw["pe"]

    # upsample: ConvTranspose (+BN folded, k-major columns), Conv k=5 (+BN folded)
    if cfg["upsampled_len"] > cfg["seq_len"]:
        s, t = bn_scale_shift(raw["up_bn1_g"], raw["up_bn1_b"])
        wt = raw["up_wt"] * s[None, :, None]               # (Cin, Cout, k)
        p["up_wt"] = jnp.transpose(wt, (0, 2, 1)).reshape(dm, up * dm).astype(bf)
        p["up_bt"] = jnp.tile(raw["up_bt"] * s + t, up).reshape(1, -1)
        s, t = bn_scale_shift(raw["up_bn2_g"], raw["up_bn2_b"])
        p["up_w2"] = conv_w(raw["up_w2"] * s[None, None, :])
        p["up_b2"] = (raw["up_b2"] * s + t).reshape(1, -1)

    # proj: first conv normal layout, final conv pre-transposed for the
    # lane-dense (B, Cout, L_up) output
    p["proj_w1"] = conv_w(raw["proj_w1"])
    p["proj_b1"] = raw["proj_b1"].reshape(1, -1)
    k2, ci2, co2 = raw["proj_w2"].shape
    p["proj_w2"] = raw["proj_w2"].reshape(k2 * ci2, co2).T.astype(bf)  # (Cout, k*Cin)
    p["proj_b2"] = raw["proj_b2"].reshape(-1, 1)                       # (Cout, 1)

    # encoder layers: fused QKV (scale folded into Q), bf16 weights
    scale = 1.0 / math.sqrt(dm // cfg["nhead"])
    p["layers"] = []
    for lr in raw["layers"]:
        p["layers"].append(dict(
            wqkv=jnp.concatenate([lr["wq"] * scale, lr["wk"], lr["wv"]],
                                 axis=1).astype(bf),
            bqkv=jnp.concatenate([lr["bq"] * scale, lr["bk"], lr["bv"]]).reshape(1, -1),
            wo=lr["wo"].astype(bf), bo=lr["bo"].reshape(1, -1),
            ln1_g=lr["ln1_g"].reshape(1, -1), ln1_b=lr["ln1_b"].reshape(1, -1),
            w_ff1=lr["w_ff1"].astype(bf), b_ff1=lr["b_ff1"].reshape(1, -1),
            w_ff2=lr["w_ff2"].astype(bf), b_ff2=lr["b_ff2"].reshape(1, -1),
            ln2_g=lr["ln2_g"].reshape(1, -1), ln2_b=lr["ln2_b"].reshape(1, -1),
        ))
    return p


# ---------------------------------------------------------------------------

if __name__ == "__main__":
    cfg = dict(seq_len=8, in_channels=1, d_model=32, nhead=4, num_layers=2,
               dim_feedforward=64, out_channels=2, upsampled_len=32)
    key = jax.random.PRNGKey(0)
    pkey, xkey = jax.random.split(key)
    raw = init_params(pkey, cfg)
    params = prepare_params(raw, cfg)

    B = 2
    x = jax.random.normal(xkey, (B, cfg["seq_len"], cfg["in_channels"]), jnp.float32)

    fwd = jax.jit(functools.partial(signal_decomposition_transformer, cfg=cfg))
    out = fwd(x, params)
    out = jax.block_until_ready(out)
    assert out.shape == (B, cfg["out_channels"], cfg["upsampled_len"]), out.shape
    assert bool(jnp.all(jnp.isfinite(out)))
    print("KERNEL_OK")
</pallas_src>

<mosaic_0001>
module attributes {stable_mosaic.version = 11 : i64} {
  func.func @_conv1d_kernel(%arg0: i32, %arg1: memref<1x10x1xf32, #tpu.memory_space<vmem>>, %arg2: memref<3x16xbf16, #tpu.memory_space<vmem>>, %arg3: memref<1x16xf32, #tpu.memory_space<vmem>>, %arg4: memref<1x8x16xf32, #tpu.memory_space<vmem>>) attributes {dimension_semantics = [#tpu.dimension_semantics<parallel>], iteration_bounds = array<i64: 2>, scalar_prefetch = 0 : i64, scratch_operands = 0 : i64, tpu.core_type = #tpu.core_type<tc>, window_params = [{transform_indices = @transform_0, window_bounds = array<i64: 1, 10, 1>}, {pipeline_mode = #tpu.pipeline_mode<synchronous>, transform_indices = @transform_1, window_bounds = array<i64: 3, 16>}, {pipeline_mode = #tpu.pipeline_mode<synchronous>, transform_indices = @transform_2, window_bounds = array<i64: 1, 16>}, {transform_indices = @transform_3, window_bounds = array<i64: 1, 8, 16>}]} {
    %c0 = arith.constant 0 : index
    %c0_0 = arith.constant 0 : index
    %c0_1 = arith.constant 0 : index
    %0 = vector.load %arg1[%c0, %c0_0, %c0_1] : memref<1x10x1xf32, #tpu.memory_space<vmem>>, vector<1x10x1xf32>
    %1 = vector.shape_cast %0 : vector<1x10x1xf32> to vector<10x1xf32>
    %2 = vector.extract_strided_slice %1 {offsets = [0, 0], sizes = [8, 1], strides = [1, 1]} : vector<10x1xf32> to vector<8x1xf32>
    %3 = vector.extract_strided_slice %1 {offsets = [1, 0], sizes = [8, 1], strides = [1, 1]} : vector<10x1xf32> to vector<8x1xf32>
    %4 = vector.extract_strided_slice %1 {offsets = [2, 0], sizes = [8, 1], strides = [1, 1]} : vector<10x1xf32> to vector<8x1xf32>
    %5 = tpu.concatenate %2, %3, %4 in 1 : vector<8x1xf32>, vector<8x1xf32>, vector<8x1xf32> -> vector<8x3xf32>
    %6 = arith.truncf %5 : vector<8x3xf32> to vector<8x3xbf16>
    %c0_2 = arith.constant 0 : index
    %c0_3 = arith.constant 0 : index
    %7 = vector.load %arg2[%c0_2, %c0_3] : memref<3x16xbf16, #tpu.memory_space<vmem>>, vector<3x16xbf16>
    %cst = arith.constant dense<0.000000e+00> : vector<8x16xf32>
    %8 = tpu.matmul %6, %7, %cst {dimension_numbers = #tpu.dot_dimension_numbers<[1], [0], [0], [1], [0, 0, 1, 1], [], []>} : vector<8x3xbf16>, vector<3x16xbf16>, vector<8x16xf32> -> vector<8x16xf32>
    %c0_4 = arith.constant 0 : index
    %c0_5 = arith.constant 0 : index
    %9 = vector.load %arg3[%c0_4, %c0_5] : memref<1x16xf32, #tpu.memory_space<vmem>>, vector<1x16xf32>
    %10 = vector.broadcast %9 : vector<1x16xf32> to vector<8x16xf32>
    %11 = arith.addf %8, %10 : vector<8x16xf32>
    %cst_6 = arith.constant 0.000000e+00 : f32
    %12 = vector.broadcast %cst_6 : f32 to vector<8x16xf32>
    %13 = arith.maximumf %11, %12 : vector<8x16xf32>
    %c0_7 = arith.constant 0 : index
    %c0_8 = arith.constant 0 : index
    %c0_9 = arith.constant 0 : index
    %14 = vector.load %arg4[%c0_7, %c0_8, %c0_9] : memref<1x8x16xf32, #tpu.memory_space<vmem>>, vector<1x8x16xf32>
    %15 = vector.shape_cast %14 : vector<1x8x16xf32> to vector<8x16xf32>
    %16 = vector.shape_cast %13 : vector<8x16xf32> to vector<1x8x16xf32>
    tpu.vector_store %arg4[%c0_7, %c0_8, %c0_9], %16 {strides = array<i32>} : memref<1x8x16xf32, #tpu.memory_space<vmem>>, vector<1x8x16xf32>,
    return
  }
  func.func @transform_0(%arg0: i32) -> (i32, i32, i32) {
    %c0_i32 = arith.constant 0 : i32
    %c0_i32_0 = arith.constant 0 : i32
    %c0_i32_1 = arith.constant 0 : i32
    return %arg0, %c0_i32, %c0_i32_0 : i32, i32, i32
  }
  func.func @transform_1(%arg0: i32) -> (i32, i32) {
    %c0_i32 = arith.constant 0 : i32
    %c0_i32_0 = arith.constant 0 : i32
    %c0_i32_1 = arith.constant 0 : i32
    return %c0_i32, %c0_i32_0 : i32, i32
  }
  func.func @transform_2(%arg0: i32) -> (i32, i32) {
    %c0_i32 = arith.constant 0 : i32
    %c0_i32_0 = arith.constant 0 : i32
    %c0_i32_1 = arith.constant 0 : i32
    return %c0_i32, %c0_i32_0 : i32, i32
  }
  func.func @transform_3(%arg0: i32) -> (i32, i32, i32) {
    %c0_i32 = arith.constant 0 : i32
    %c0_i32_0 = arith.constant 0 : i32
    %c0_i32_1 = arith.constant 0 : i32
    return %arg0, %c0_i32, %c0_i32_0 : i32, i32, i32
  }
}

module attributes {stable_mosaic.version = 11 : i64} {
  func.func @_conv1d_kernel(%arg0: i32, %arg1: memref<1x10x16xf32, #tpu.memory_space<vmem>>, %arg2: memref<48x32xbf16, #tpu.memory_space<vmem>>, %arg3: memref<1x32xf32, #tpu.memory_space<vmem>>, %arg4: memref<8x32xf32, #tpu.memory_space<vmem>>, %arg5: memref<1x8x32xf32, #tpu.memory_space<vmem>>) attributes {dimension_semantics = [#tpu.dimension_semantics<parallel>], iteration_bounds = array<i64: 2>, scalar_prefetch = 0 : i64, scratch_operands = 0 : i64, tpu.core_type = #tpu.core_type<tc>, window_params = [{transform_indices = @transform_0, window_bounds = array<i64: 1, 10, 16>}, {pipeline_mode = #tpu.pipeline_mode<synchronous>, transform_indices = @transform_1, window_bounds = array<i64: 48, 32>}, {pipeline_mode = #tpu.pipeline_mode<synchronous>, transform_indices = @transform_2, window_bounds = array<i64: 1, 32>}, {pipeline_mode = #tpu.pipeline_mode<synchronous>, transform_indices = @transform_3, window_bounds = array<i64: 8, 32>}, {transform_indices = @transform_4, window_bounds = array<i64: 1, 8, 32>}]} {
    %c0 = arith.constant 0 : index
    %c0_0 = arith.constant 0 : index
    %c0_1 = arith.constant 0 : index
    %0 = vector.load %arg1[%c0, %c0_0, %c0_1] : memref<1x10x16xf32, #tpu.memory_space<vmem>>, vector<1x10x16xf32>
    %1 = vector.shape_cast %0 : vector<1x10x16xf32> to vector<10x16xf32>
    %2 = vector.extract_strided_slice %1 {offsets = [0, 0], sizes = [8, 16], strides = [1, 1]} : vector<10x16xf32> to vector<8x16xf32>
    %3 = vector.extract_strided_slice %1 {offsets = [1, 0], sizes = [8, 16], strides = [1, 1]} : vector<10x16xf32> to vector<8x16xf32>
    %4 = vector.extract_strided_slice %1 {offsets = [2, 0], sizes = [8, 16], strides = [1, 1]} : vector<10x16xf32> to vector<8x16xf32>
    %5 = tpu.concatenate %2, %3, %4 in 1 : vector<8x16xf32>, vector<8x16xf32>, vector<8x16xf32> -> vector<8x48xf32>
    %6 = arith.truncf %5 : vector<8x48xf32> to vector<8x48xbf16>
    %c0_2 = arith.constant 0 : index
    %c0_3 = arith.constant 0 : index
    %7 = vector.load %arg2[%c0_2, %c0_3] : memref<48x32xbf16, #tpu.memory_space<vmem>>, vector<48x32xbf16>
    %cst = arith.constant dense<0.000000e+00> : vector<8x32xf32>
    %8 = tpu.matmul %6, %7, %cst {dimension_numbers = #tpu.dot_dimension_numbers<[1], [0], [0], [1], [0, 0, 1, 1], [], []>} : vector<8x48xbf16>, vector<48x32xbf16>, vector<8x32xf32> -> vector<8x32xf32>
    %c0_4 = arith.constant 0 : index
    %c0_5 = arith.constant 0 : index
    %9 = vector.load %arg3[%c0_4, %c0_5] : memref<1x32xf32, #tpu.memory_space<vmem>>, vector<1x32xf32>
    %10 = vector.broadcast %9 : vector<1x32xf32> to vector<8x32xf32>
    %11 = arith.addf %8, %10 : vector<8x32xf32>
    %c0_6 = arith.constant 0 : index
    %c0_7 = arith.constant 0 : index
    %12 = vector.load %arg4[%c0_6, %c0_7] : memref<8x32xf32, #tpu.memory_space<vmem>>, vector<8x32xf32>
    %13 = arith.addf %11, %12 : vector<8x32xf32>
    %c0_8 = arith.constant 0 : index
    %c0_9 = arith.constant 0 : index
    %c0_10 = arith.constant 0 : index
    %14 = vector.load %arg5[%c0_8, %c0_9, %c0_10] : memref<1x8x32xf32, #tpu.memory_space<vmem>>, vector<1x8x32xf32>
    %15 = vector.shape_cast %14 : vector<1x8x32xf32> to vector<8x32xf32>
    %16 = vector.shape_cast %13 : vector<8x32xf32> to vector<1x8x32xf32>
    tpu.vector_store %arg5[%c0_8, %c0_9, %c0_10], %16 {strides = array<i32>} : memref<1x8x32xf32, #tpu.memory_space<vmem>>, vector<1x8x32xf32>,
    return
  }
  func.func @transform_0(%arg0: i32) -> (i32, i32, i32) {
    %c0_i32 = arith.constant 0 : i32
    %c0_i32_0 = arith.constant 0 : i32
    %c0_i32_1 = arith.constant 0 : i32
    return %arg0, %c0_i32, %c0_i32_0 : i32, i32, i32
  }
  func.func @transform_1(%arg0: i32) -> (i32, i32) {
    %c0_i32 = arith.constant 0 : i32
    %c0_i32_0 = arith.constant 0 : i32
    %c0_i32_1 = arith.constant 0 : i32
    return %c0_i32, %c0_i32_0 : i32, i32
  }
  func.func @transform_2(%arg0: i32) -> (i32, i32) {
    %c0_i32 = arith.constant 0 : i32
    %c0_i32_0 = arith.constant 0 : i32
    %c0_i32_1 = arith.constant 0 : i32
    return %c0_i32, %c0_i32_0 : i32, i32
  }
  func.func @transform_3(%arg0: i32) -> (i32, i32) {
    %c0_i32 = arith.constant 0 : i32
    %c0_i32_0 = arith.constant 0 : i32
    %c0_i32_1 = arith.constant 0 : i32
    return %c0_i32, %c0_i32_0 : i32, i32
  }
  func.func @transform_4(%arg0: i32) -> (i32, i32, i32) {
    %c0_i32 = arith.constant 0 : i32
    %c0_i32_0 = arith.constant 0 : i32
    %c0_i32_1 = arith.constant 0 : i32
    return %arg0, %c0_i32, %c0_i32_0 : i32, i32, i32
  }
}

module attributes {stable_mosaic.version = 11 : i64} {
  func.func @_matmul_bias_act_kernel(%arg0: i32, %arg1: memref<8x32xf32, #tpu.memory_space<vmem>>, %arg2: memref<32x96xbf16, #tpu.memory_space<vmem>>, %arg3: memref<1x96xf32, #tpu.memory_space<vmem>>, %arg4: memref<8x96xbf16, #tpu.memory_space<vmem>>) attributes {dimension_semantics = [#tpu.dimension_semantics<parallel>], iteration_bounds = array<i64: 2>, scalar_prefetch = 0 : i64, scratch_operands = 0 : i64, tpu.core_type = #tpu.core_type<tc>, window_params = [{transform_indices = @transform_0, window_bounds = array<i64: 8, 32>}, {pipeline_mode = #tpu.pipeline_mode<synchronous>, transform_indices = @transform_1, window_bounds = array<i64: 32, 96>}, {pipeline_mode = #tpu.pipeline_mode<synchronous>, transform_indices = @transform_2, window_bounds = array<i64: 1, 96>}, {transform_indices = @transform_3, window_bounds = array<i64: 8, 96>}]} {
    %c0 = arith.constant 0 : index
    %c0_0 = arith.constant 0 : index
    %0 = vector.load %arg1[%c0, %c0_0] : memref<8x32xf32, #tpu.memory_space<vmem>>, vector<8x32xf32>
    %1 = arith.truncf %0 : vector<8x32xf32> to vector<8x32xbf16>
    %c0_1 = arith.constant 0 : index
    %c0_2 = arith.constant 0 : index
    %2 = vector.load %arg2[%c0_1, %c0_2] : memref<32x96xbf16, #tpu.memory_space<vmem>>, vector<32x96xbf16>
    %cst = arith.constant dense<0.000000e+00> : vector<8x96xf32>
    %3 = tpu.matmul %1, %2, %cst {dimension_numbers = #tpu.dot_dimension_numbers<[1], [0], [0], [1], [0, 0, 1, 1], [], []>} : vector<8x32xbf16>, vector<32x96xbf16>, vector<8x96xf32> -> vector<8x96xf32>
    %c0_3 = arith.constant 0 : index
    %c0_4 = arith.constant 0 : index
    %4 = vector.load %arg3[%c0_3, %c0_4] : memref<1x96xf32, #tpu.memory_space<vmem>>, vector<1x96xf32>
    %5 = vector.broadcast %4 : vector<1x96xf32> to vector<8x96xf32>
    %6 = arith.addf %3, %5 : vector<8x96xf32>
    %7 = arith.truncf %6 : vector<8x96xf32> to vector<8x96xbf16>
    %c0_5 = arith.constant 0 : index
    %c0_6 = arith.constant 0 : index
    %8 = vector.load %arg4[%c0_5, %c0_6] : memref<8x96xbf16, #tpu.memory_space<vmem>>, vector<8x96xbf16>
    tpu.vector_store %arg4[%c0_5, %c0_6], %7 {strides = array<i32>} : memref<8x96xbf16, #tpu.memory_space<vmem>>, vector<8x96xbf16>,
    return
  }
  func.func @transform_0(%arg0: i32) -> (i32, i32) {
    %c0_i32 = arith.constant 0 : i32
    %c0_i32_0 = arith.constant 0 : i32
    return %arg0, %c0_i32 : i32, i32
  }
  func.func @transform_1(%arg0: i32) -> (i32, i32) {
    %c0_i32 = arith.constant 0 : i32
    %c0_i32_0 = arith.constant 0 : i32
    %c0_i32_1 = arith.constant 0 : i32
    return %c0_i32, %c0_i32_0 : i32, i32
  }
  func.func @transform_2(%arg0: i32) -> (i32, i32) {
    %c0_i32 = arith.constant 0 : i32
    %c0_i32_0 = arith.constant 0 : i32
    %c0_i32_1 = arith.constant 0 : i32
    return %c0_i32, %c0_i32_0 : i32, i32
  }
  func.func @transform_3(%arg0: i32) -> (i32, i32) {
    %c0_i32 = arith.constant 0 : i32
    %c0_i32_0 = arith.constant 0 : i32
    return %arg0, %c0_i32 : i32, i32
  }
}

module attributes {stable_mosaic.version = 11 : i64} {
  func.func @_attention_kernel(%arg0: i32, %arg1: memref<8x96xbf16, #tpu.memory_space<vmem>>, %arg2: memref<8x32xbf16, #tpu.memory_space<vmem>>) attributes {dimension_semantics = [#tpu.dimension_semantics<parallel>], iteration_bounds = array<i64: 2>, scalar_prefetch = 0 : i64, scratch_operands = 0 : i64, tpu.core_type = #tpu.core_type<tc>, window_params = [{transform_indices = @transform_0, window_bounds = array<i64: 8, 96>}, {transform_indices = @transform_1, window_bounds = array<i64: 8, 32>}]} {
    %c0 = arith.constant 0 : index
    %c0_0 = arith.constant 0 : index
    %0 = vector.load %arg1[%c0, %c0_0] : memref<8x96xbf16, #tpu.memory_space<vmem>>, vector<8x96xbf16>
    %1 = vector.extract_strided_slice %0 {offsets = [0, 0], sizes = [8, 8], strides = [1, 1]} : vector<8x96xbf16> to vector<8x8xbf16>
    %2 = vector.extract_strided_slice %0 {offsets = [0, 32], sizes = [8, 8], strides = [1, 1]} : vector<8x96xbf16> to vector<8x8xbf16>
    %3 = vector.extract_strided_slice %0 {offsets = [0, 64], sizes = [8, 8], strides = [1, 1]} : vector<8x96xbf16> to vector<8x8xbf16>
    %cst = arith.constant dense<0.000000e+00> : vector<8x8xf32>
    %4 = tpu.matmul %1, %2, %cst {dimension_numbers = #tpu.dot_dimension_numbers<[1], [1], [0], [0], [0, 0, 1, 0], [], []>} : vector<8x8xbf16>, vector<8x8xbf16>, vector<8x8xf32> -> vector<8x8xf32>
    %cst_1 = arith.constant dense<0xFF800000> : vector<8xf32>
    %5 = vector.multi_reduction <maximumf>, %4, %cst_1 [1] : vector<8x8xf32> to vector<8xf32>
    %6 = vector.shape_cast %5 : vector<8xf32> to vector<8x1xf32>
    %7 = vector.broadcast %6 : vector<8x1xf32> to vector<8x8xf32>
    %8 = arith.subf %4, %7 : vector<8x8xf32>
    %9 = math.exp %8 : vector<8x8xf32>
    %cst_2 = arith.constant dense<0.000000e+00> : vector<8xf32>
    %10 = vector.multi_reduction <add>, %9, %cst_2 [1] : vector<8x8xf32> to vector<8xf32>
    %11 = vector.shape_cast %10 : vector<8xf32> to vector<8x1xf32>
    %12 = arith.truncf %9 : vector<8x8xf32> to vector<8x8xbf16>
    %cst_3 = arith.constant dense<0.000000e+00> : vector<8x8xf32>
    %13 = tpu.matmul %12, %3, %cst_3 {dimension_numbers = #tpu.dot_dimension_numbers<[1], [0], [0], [1], [0, 0, 1, 1], [], []>} : vector<8x8xbf16>, vector<8x8xbf16>, vector<8x8xf32> -> vector<8x8xf32>
    %14 = tpu.reciprocal %11 {approx = true} : vector<8x1xf32> -> vector<8x1xf32>
    %15 = vector.broadcast %14 : vector<8x1xf32> to vector<8x8xf32>
    %16 = arith.mulf %13, %15 : vector<8x8xf32>
    %17 = vector.extract_strided_slice %0 {offsets = [0, 8], sizes = [8, 8], strides = [1, 1]} : vector<8x96xbf16> to vector<8x8xbf16>
    %18 = vector.extract_strided_slice %0 {offsets = [0, 40], sizes = [8, 8], strides = [1, 1]} : vector<8x96xbf16> to vector<8x8xbf16>
    %19 = vector.extract_strided_slice %0 {offsets = [0, 72], sizes = [8, 8], strides = [1, 1]} : vector<8x96xbf16> to vector<8x8xbf16>
    %cst_4 = arith.constant dense<0.000000e+00> : vector<8x8xf32>
    %20 = tpu.matmul %17, %18, %cst_4 {dimension_numbers = #tpu.dot_dimension_numbers<[1], [1], [0], [0], [0, 0, 1, 0], [], []>} : vector<8x8xbf16>, vector<8x8xbf16>, vector<8x8xf32> -> vector<8x8xf32>
    %cst_5 = arith.constant dense<0xFF800000> : vector<8xf32>
    %21 = vector.multi_reduction <maximumf>, %20, %cst_5 [1] : vector<8x8xf32> to vector<8xf32>
    %22 = vector.shape_cast %21 : vector<8xf32> to vector<8x1xf32>
    %23 = vector.broadcast %22 : vector<8x1xf32> to vector<8x8xf32>
    %24 = arith.subf %20, %23 : vector<8x8xf32>
    %25 = math.exp %24 : vector<8x8xf32>
    %cst_6 = arith.constant dense<0.000000e+00> : vector<8xf32>
    %26 = vector.multi_reduction <add>, %25, %cst_6 [1] : vector<8x8xf32> to vector<8xf32>
    %27 = vector.shape_cast %26 : vector<8xf32> to vector<8x1xf32>
    %28 = arith.truncf %25 : vector<8x8xf32> to vector<8x8xbf16>
    %cst_7 = arith.constant dense<0.000000e+00> : vector<8x8xf32>
    %29 = tpu.matmul %28, %19, %cst_7 {dimension_numbers = #tpu.dot_dimension_numbers<[1], [0], [0], [1], [0, 0, 1, 1], [], []>} : vector<8x8xbf16>, vector<8x8xbf16>, vector<8x8xf32> -> vector<8x8xf32>
    %30 = tpu.reciprocal %27 {approx = true} : vector<8x1xf32> -> vector<8x1xf32>
    %31 = vector.broadcast %30 : vector<8x1xf32> to vector<8x8xf32>
    %32 = arith.mulf %29, %31 : vector<8x8xf32>
    %33 = vector.extract_strided_slice %0 {offsets = [0, 16], sizes = [8, 8], strides = [1, 1]} : vector<8x96xbf16> to vector<8x8xbf16>
    %34 = vector.extract_strided_slice %0 {offsets = [0, 48], sizes = [8, 8], strides = [1, 1]} : vector<8x96xbf16> to vector<8x8xbf16>
    %35 = vector.extract_strided_slice %0 {offsets = [0, 80], sizes = [8, 8], strides = [1, 1]} : vector<8x96xbf16> to vector<8x8xbf16>
    %cst_8 = arith.constant dense<0.000000e+00> : vector<8x8xf32>
    %36 = tpu.matmul %33, %34, %cst_8 {dimension_numbers = #tpu.dot_dimension_numbers<[1], [1], [0], [0], [0, 0, 1, 0], [], []>} : vector<8x8xbf16>, vector<8x8xbf16>, vector<8x8xf32> -> vector<8x8xf32>
    %cst_9 = arith.constant dense<0xFF800000> : vector<8xf32>
    %37 = vector.multi_reduction <maximumf>, %36, %cst_9 [1] : vector<8x8xf32> to vector<8xf32>
    %38 = vector.shape_cast %37 : vector<8xf32> to vector<8x1xf32>
    %39 = vector.broadcast %38 : vector<8x1xf32> to vector<8x8xf32>
    %40 = arith.subf %36, %39 : vector<8x8xf32>
    %41 = math.exp %40 : vector<8x8xf32>
    %cst_10 = arith.constant dense<0.000000e+00> : vector<8xf32>
    %42 = vector.multi_reduction <add>, %41, %cst_10 [1] : vector<8x8xf32> to vector<8xf32>
    %43 = vector.shape_cast %42 : vector<8xf32> to vector<8x1xf32>
    %44 = arith.truncf %41 : vector<8x8xf32> to vector<8x8xbf16>
    %cst_11 = arith.constant dense<0.000000e+00> : vector<8x8xf32>
    %45 = tpu.matmul %44, %35, %cst_11 {dimension_numbers = #tpu.dot_dimension_numbers<[1], [0], [0], [1], [0, 0, 1, 1], [], []>} : vector<8x8xbf16>, vector<8x8xbf16>, vector<8x8xf32> -> vector<8x8xf32>
    %46 = tpu.reciprocal %43 {approx = true} : vector<8x1xf32> -> vector<8x1xf32>
    %47 = vector.broadcast %46 : vector<8x1xf32> to vector<8x8xf32>
    %48 = arith.mulf %45, %47 : vector<8x8xf32>
    %49 = vector.extract_strided_slice %0 {offsets = [0, 24], sizes = [8, 8], strides = [1, 1]} : vector<8x96xbf16> to vector<8x8xbf16>
    %50 = vector.extract_strided_slice %0 {offsets = [0, 56], sizes = [8, 8], strides = [1, 1]} : vector<8x96xbf16> to vector<8x8xbf16>
    %51 = vector.extract_strided_slice %0 {offsets = [0, 88], sizes = [8, 8], strides = [1, 1]} : vector<8x96xbf16> to vector<8x8xbf16>
    %cst_12 = arith.constant dense<0.000000e+00> : vector<8x8xf32>
    %52 = tpu.matmul %49, %50, %cst_12 {dimension_numbers = #tpu.dot_dimension_numbers<[1], [1], [0], [0], [0, 0, 1, 0], [], []>} : vector<8x8xbf16>, vector<8x8xbf16>, vector<8x8xf32> -> vector<8x8xf32>
    %cst_13 = arith.constant dense<0xFF800000> : vector<8xf32>
    %53 = vector.multi_reduction <maximumf>, %52, %cst_13 [1] : vector<8x8xf32> to vector<8xf32>
    %54 = vector.shape_cast %53 : vector<8xf32> to vector<8x1xf32>
    %55 = vector.broadcast %54 : vector<8x1xf32> to vector<8x8xf32>
    %56 = arith.subf %52, %55 : vector<8x8xf32>
    %57 = math.exp %56 : vector<8x8xf32>
    %cst_14 = arith.constant dense<0.000000e+00> : vector<8xf32>
    %58 = vector.multi_reduction <add>, %57, %cst_14 [1] : vector<8x8xf32> to vector<8xf32>
    %59 = vector.shape_cast %58 : vector<8xf32> to vector<8x1xf32>
    %60 = arith.truncf %57 : vector<8x8xf32> to vector<8x8xbf16>
    %cst_15 = arith.constant dense<0.000000e+00> : vector<8x8xf32>
    %61 = tpu.matmul %60, %51, %cst_15 {dimension_numbers = #tpu.dot_dimension_numbers<[1], [0], [0], [1], [0, 0, 1, 1], [], []>} : vector<8x8xbf16>, vector<8x8xbf16>, vector<8x8xf32> -> vector<8x8xf32>
    %62 = tpu.reciprocal %59 {approx = true} : vector<8x1xf32> -> vector<8x1xf32>
    %63 = vector.broadcast %62 : vector<8x1xf32> to vector<8x8xf32>
    %64 = arith.mulf %61, %63 : vector<8x8xf32>
    %65 = tpu.concatenate %16, %32, %48, %64 in 1 : vector<8x8xf32>, vector<8x8xf32>, vector<8x8xf32>, vector<8x8xf32> -> vector<8x32xf32>
    %66 = arith.truncf %65 : vector<8x32xf32> to vector<8x32xbf16>
    %c0_16 = arith.constant 0 : index
    %c0_17 = arith.constant 0 : index
    %67 = vector.load %arg2[%c0_16, %c0_17] : memref<8x32xbf16, #tpu.memory_space<vmem>>, vector<8x32xbf16>
    tpu.vector_store %arg2[%c0_16, %c0_17], %66 {strides = array<i32>} : memref<8x32xbf16, #tpu.memory_space<vmem>>, vector<8x32xbf16>,
    return
  }
  func.func @transform_0(%arg0: i32) -> (i32, i32) {
    %c0_i32 = arith.constant 0 : i32
    %c0_i32_0 = arith.constant 0 : i32
    return %arg0, %c0_i32 : i32, i32
  }
  func.func @transform_1(%arg0: i32) -> (i32, i32) {
    %c0_i32 = arith.constant 0 : i32
    %c0_i32_0 = arith.constant 0 : i32
    return %arg0, %c0_i32 : i32, i32
  }
}

module attributes {stable_mosaic.version = 11 : i64} {
  func.func @_outproj_add_ln_kernel(%arg0: i32, %arg1: memref<8x32xbf16, #tpu.memory_space<vmem>>, %arg2: memref<8x32xf32, #tpu.memory_space<vmem>>, %arg3: memref<32x32xbf16, #tpu.memory_space<vmem>>, %arg4: memref<1x32xf32, #tpu.memory_space<vmem>>, %arg5: memref<1x32xf32, #tpu.memory_space<vmem>>, %arg6: memref<1x32xf32, #tpu.memory_space<vmem>>, %arg7: memref<8x32xf32, #tpu.memory_space<vmem>>) attributes {dimension_semantics = [#tpu.dimension_semantics<parallel>], iteration_bounds = array<i64: 2>, scalar_prefetch = 0 : i64, scratch_operands = 0 : i64, tpu.core_type = #tpu.core_type<tc>, window_params = [{transform_indices = @transform_0, window_bounds = array<i64: 8, 32>}, {transform_indices = @transform_1, window_bounds = array<i64: 8, 32>}, {pipeline_mode = #tpu.pipeline_mode<synchronous>, transform_indices = @transform_2, window_bounds = array<i64: 32, 32>}, {pipeline_mode = #tpu.pipeline_mode<synchronous>, transform_indices = @transform_3, window_bounds = array<i64: 1, 32>}, {pipeline_mode = #tpu.pipeline_mode<synchronous>, transform_indices = @transform_4, window_bounds = array<i64: 1, 32>}, {pipeline_mode = #tpu.pipeline_mode<synchronous>, transform_indices = @transform_5, window_bounds = array<i64: 1, 32>}, {transform_indices = @transform_6, window_bounds = array<i64: 8, 32>}]} {
    %c0 = arith.constant 0 : index
    %c0_0 = arith.constant 0 : index
    %0 = vector.load %arg1[%c0, %c0_0] : memref<8x32xbf16, #tpu.memory_space<vmem>>, vector<8x32xbf16>
    %c0_1 = arith.constant 0 : index
    %c0_2 = arith.constant 0 : index
    %1 = vector.load %arg3[%c0_1, %c0_2] : memref<32x32xbf16, #tpu.memory_space<vmem>>, vector<32x32xbf16>
    %cst = arith.constant dense<0.000000e+00> : vector<8x32xf32>
    %2 = tpu.matmul %0, %1, %cst {dimension_numbers = #tpu.dot_dimension_numbers<[1], [0], [0], [1], [0, 0, 1, 1], [], []>} : vector<8x32xbf16>, vector<32x32xbf16>, vector<8x32xf32> -> vector<8x32xf32>
    %c0_3 = arith.constant 0 : index
    %c0_4 = arith.constant 0 : index
    %3 = vector.load %arg4[%c0_3, %c0_4] : memref<1x32xf32, #tpu.memory_space<vmem>>, vector<1x32xf32>
    %4 = vector.broadcast %3 : vector<1x32xf32> to vector<8x32xf32>
    %5 = arith.addf %2, %4 : vector<8x32xf32>
    %c0_5 = arith.constant 0 : index
    %c0_6 = arith.constant 0 : index
    %6 = vector.load %arg2[%c0_5, %c0_6] : memref<8x32xf32, #tpu.memory_space<vmem>>, vector<8x32xf32>
    %7 = arith.addf %6, %5 : vector<8x32xf32>
    %cst_7 = arith.constant dense<0.000000e+00> : vector<8xf32>
    %8 = vector.multi_reduction <add>, %7, %cst_7 [1] : vector<8x32xf32> to vector<8xf32>
    %9 = vector.shape_cast %8 : vector<8xf32> to vector<8x1xf32>
    %cst_8 = arith.constant 3.200000e+01 : f32
    %10 = vector.broadcast %cst_8 : f32 to vector<8x1xf32>
    %11 = arith.divf %9, %10 : vector<8x1xf32>
    %12 = vector.broadcast %11 : vector<8x1xf32> to vector<8x32xf32>
    %13 = arith.subf %7, %12 : vector<8x32xf32>
    %14 = arith.mulf %13, %13 : vector<8x32xf32>
    %cst_9 = arith.constant dense<0.000000e+00> : vector<8xf32>
    %15 = vector.multi_reduction <add>, %14, %cst_9 [1] : vector<8x32xf32> to vector<8xf32>
    %16 = vector.shape_cast %15 : vector<8xf32> to vector<8x1xf32>
    %cst_10 = arith.constant 3.200000e+01 : f32
    %17 = vector.broadcast %cst_10 : f32 to vector<8x1xf32>
    %18 = arith.divf %16, %17 : vector<8x1xf32>
    %19 = vector.broadcast %11 : vector<8x1xf32> to vector<8x32xf32>
    %20 = arith.subf %7, %19 : vector<8x32xf32>
    %cst_11 = arith.constant 9.99999974E-6 : f32
    %21 = vector.broadcast %cst_11 : f32 to vector<8x1xf32>
    %22 = arith.addf %18, %21 : vector<8x1xf32>
    %23 = math.rsqrt %22 : vector<8x1xf32>
    %24 = vector.broadcast %23 : vector<8x1xf32> to vector<8x32xf32>
    %25 = arith.mulf %20, %24 : vector<8x32xf32>
    %c0_12 = arith.constant 0 : index
    %c0_13 = arith.constant 0 : index
    %26 = vector.load %arg5[%c0_12, %c0_13] : memref<1x32xf32, #tpu.memory_space<vmem>>, vector<1x32xf32>
    %27 = vector.broadcast %26 : vector<1x32xf32> to vector<8x32xf32>
    %28 = arith.mulf %25, %27 : vector<8x32xf32>
    %c0_14 = arith.constant 0 : index
    %c0_15 = arith.constant 0 : index
    %29 = vector.load %arg6[%c0_14, %c0_15] : memref<1x32xf32, #tpu.memory_space<vmem>>, vector<1x32xf32>
    %30 = vector.broadcast %29 : vector<1x32xf32> to vector<8x32xf32>
    %31 = arith.addf %28, %30 : vector<8x32xf32>
    %c0_16 = arith.constant 0 : index
    %c0_17 = arith.constant 0 : index
    %32 = vector.load %arg7[%c0_16, %c0_17] : memref<8x32xf32, #tpu.memory_space<vmem>>, vector<8x32xf32>
    tpu.vector_store %arg7[%c0_16, %c0_17], %31 {strides = array<i32>} : memref<8x32xf32, #tpu.memory_space<vmem>>, vector<8x32xf32>,
    return
  }
  func.func @transform_0(%arg0: i32) -> (i32, i32) {
    %c0_i32 = arith.constant 0 : i32
    %c0_i32_0 = arith.constant 0 : i32
    return %arg0, %c0_i32 : i32, i32
  }
  func.func @transform_1(%arg0: i32) -> (i32, i32) {
    %c0_i32 = arith.constant 0 : i32
    %c0_i32_0 = arith.constant 0 : i32
    return %arg0, %c0_i32 : i32, i32
  }
  func.func @transform_2(%arg0: i32) -> (i32, i32) {
    %c0_i32 = arith.constant 0 : i32
    %c0_i32_0 = arith.constant 0 : i32
    %c0_i32_1 = arith.constant 0 : i32
    return %c0_i32, %c0_i32_0 : i32, i32
  }
  func.func @transform_3(%arg0: i32) -> (i32, i32) {
    %c0_i32 = arith.constant 0 : i32
    %c0_i32_0 = arith.constant 0 : i32
    %c0_i32_1 = arith.constant 0 : i32
    return %c0_i32, %c0_i32_0 : i32, i32
  }
  func.func @transform_4(%arg0: i32) -> (i32, i32) {
    %c0_i32 = arith.constant 0 : i32
    %c0_i32_0 = arith.constant 0 : i32
    %c0_i32_1 = arith.constant 0 : i32
    return %c0_i32, %c0_i32_0 : i32, i32
  }
  func.func @transform_5(%arg0: i32) -> (i32, i32) {
    %c0_i32 = arith.constant 0 : i32
    %c0_i32_0 = arith.constant 0 : i32
    %c0_i32_1 = arith.constant 0 : i32
    return %c0_i32, %c0_i32_0 : i32, i32
  }
  func.func @transform_6(%arg0: i32) -> (i32, i32) {
    %c0_i32 = arith.constant 0 : i32
    %c0_i32_0 = arith.constant 0 : i32
    return %arg0, %c0_i32 : i32, i32
  }
}

module attributes {stable_mosaic.version = 11 : i64} {
  func.func @_ffn_add_ln_kernel(%arg0: i32, %arg1: memref<8x32xf32, #tpu.memory_space<vmem>>, %arg2: memref<32x64xbf16, #tpu.memory_space<vmem>>, %arg3: memref<1x64xf32, #tpu.memory_space<vmem>>, %arg4: memref<64x32xbf16, #tpu.memory_space<vmem>>, %arg5: memref<1x32xf32, #tpu.memory_space<vmem>>, %arg6: memref<1x32xf32, #tpu.memory_space<vmem>>, %arg7: memref<1x32xf32, #tpu.memory_space<vmem>>, %arg8: memref<8x32xf32, #tpu.memory_space<vmem>>) attributes {dimension_semantics = [#tpu.dimension_semantics<parallel>], iteration_bounds = array<i64: 2>, scalar_prefetch = 0 : i64, scratch_operands = 0 : i64, tpu.core_type = #tpu.core_type<tc>, window_params = [{transform_indices = @transform_0, window_bounds = array<i64: 8, 32>}, {pipeline_mode = #tpu.pipeline_mode<synchronous>, transform_indices = @transform_1, window_bounds = array<i64: 32, 64>}, {pipeline_mode = #tpu.pipeline_mode<synchronous>, transform_indices = @transform_2, window_bounds = array<i64: 1, 64>}, {pipeline_mode = #tpu.pipeline_mode<synchronous>, transform_indices = @transform_3, window_bounds = array<i64: 64, 32>}, {pipeline_mode = #tpu.pipeline_mode<synchronous>, transform_indices = @transform_4, window_bounds = array<i64: 1, 32>}, {pipeline_mode = #tpu.pipeline_mode<synchronous>, transform_indices = @transform_5, window_bounds = array<i64: 1, 32>}, {pipeline_mode = #tpu.pipeline_mode<synchronous>, transform_indices = @transform_6, window_bounds = array<i64: 1, 32>}, {transform_indices = @transform_7, window_bounds = array<i64: 8, 32>}]} {
    %c0 = arith.constant 0 : index
    %c0_0 = arith.constant 0 : index
    %0 = vector.load %arg1[%c0, %c0_0] : memref<8x32xf32, #tpu.memory_space<vmem>>, vector<8x32xf32>
    %1 = arith.truncf %0 : vector<8x32xf32> to vector<8x32xbf16>
    %c0_1 = arith.constant 0 : index
    %c0_2 = arith.constant 0 : index
    %2 = vector.load %arg2[%c0_1, %c0_2] : memref<32x64xbf16, #tpu.memory_space<vmem>>, vector<32x64xbf16>
    %cst = arith.constant dense<0.000000e+00> : vector<8x64xf32>
    %3 = tpu.matmul %1, %2, %cst {dimension_numbers = #tpu.dot_dimension_numbers<[1], [0], [0], [1], [0, 0, 1, 1], [], []>} : vector<8x32xbf16>, vector<32x64xbf16>, vector<8x64xf32> -> vector<8x64xf32>
    %c0_3 = arith.constant 0 : index
    %c0_4 = arith.constant 0 : index
    %4 = vector.load %arg3[%c0_3, %c0_4] : memref<1x64xf32, #tpu.memory_space<vmem>>, vector<1x64xf32>
    %5 = vector.broadcast %4 : vector<1x64xf32> to vector<8x64xf32>
    %6 = arith.addf %3, %5 : vector<8x64xf32>
    %cst_5 = arith.constant 5.000000e-01 : f32
    %7 = vector.broadcast %cst_5 : f32 to vector<8x64xf32>
    %8 = arith.mulf %7, %6 : vector<8x64xf32>
    %cst_6 = arith.constant 0.707106769 : f32
    %9 = vector.broadcast %cst_6 : f32 to vector<8x64xf32>
    %10 = arith.mulf %6, %9 : vector<8x64xf32>
    %11 = math.absf %10 : vector<8x64xf32>
    %cst_7 = arith.constant 0.327591091 : f32
    %12 = vector.broadcast %cst_7 : f32 to vector<8x64xf32>
    %13 = arith.mulf %12, %11 : vector<8x64xf32>
    %cst_8 = arith.constant 1.000000e+00 : f32
    %14 = vector.broadcast %cst_8 : f32 to vector<8x64xf32>
    %15 = arith.addf %14, %13 : vector<8x64xf32>
    %cst_9 = arith.constant 1.000000e+00 : f32
    %16 = vector.broadcast %cst_9 : f32 to vector<8x64xf32>
    %17 = arith.divf %16, %15 : vector<8x64xf32>
    %cst_10 = arith.constant 1.06140542 : f32
    %18 = vector.broadcast %cst_10 : f32 to vector<8x64xf32>
    %19 = arith.mulf %18, %17 : vector<8x64xf32>
    %cst_11 = arith.constant -1.45315206 : f32
    %20 = vector.broadcast %cst_11 : f32 to vector<8x64xf32>
    %21 = arith.addf %19, %20 : vector<8x64xf32>
    %22 = arith.mulf %21, %17 : vector<8x64xf32>
    %cst_12 = arith.constant 1.42141378 : f32
    %23 = vector.broadcast %cst_12 : f32 to vector<8x64xf32>
    %24 = arith.addf %22, %23 : vector<8x64xf32>
    %25 = arith.mulf %24, %17 : vector<8x64xf32>
    %cst_13 = arith.constant -0.284496725 : f32
    %26 = vector.broadcast %cst_13 : f32 to vector<8x64xf32>
    %27 = arith.addf %25, %26 : vector<8x64xf32>
    %28 = arith.mulf %27, %17 : vector<8x64xf32>
    %cst_14 = arith.constant 0.254829586 : f32
    %29 = vector.broadcast %cst_14 : f32 to vector<8x64xf32>
    %30 = arith.addf %28, %29 : vector<8x64xf32>
    %31 = arith.mulf %30, %17 : vector<8x64xf32>
    %cst_15 = arith.constant 0.000000e+00 : f32
    %32 = vector.broadcast %cst_15 : f32 to vector<8x64xf32>
    %33 = arith.subf %32, %11 : vector<8x64xf32>
    %34 = arith.mulf %33, %11 : vector<8x64xf32>
    %35 = math.exp %34 : vector<8x64xf32>
    %36 = arith.mulf %31, %35 : vector<8x64xf32>
    %cst_16 = arith.constant 1.000000e+00 : f32
    %37 = vector.broadcast %cst_16 : f32 to vector<8x64xf32>
    %38 = arith.subf %37, %36 : vector<8x64xf32>
    %cst_17 = arith.constant 0.000000e+00 : f32
    %39 = vector.broadcast %cst_17 : f32 to vector<8x64xf32>
    %40 = arith.cmpf oge, %10, %39 : vector<8x64xf32>
    %cst_18 = arith.constant 0.000000e+00 : f32
    %41 = vector.broadcast %cst_18 : f32 to vector<8x64xf32>
    %42 = arith.subf %41, %38 : vector<8x64xf32>
    %43 = arith.select %40, %38, %42 : vector<8x64xi1>, vector<8x64xf32>
    %cst_19 = arith.constant 1.000000e+00 : f32
    %44 = vector.broadcast %cst_19 : f32 to vector<8x64xf32>
    %45 = arith.addf %44, %43 : vector<8x64xf32>
    %46 = arith.mulf %8, %45 : vector<8x64xf32>
    %47 = arith.truncf %46 : vector<8x64xf32> to vector<8x64xbf16>
    %c0_20 = arith.constant 0 : index
    %c0_21 = arith.constant 0 : index
    %48 = vector.load %arg4[%c0_20, %c0_21] : memref<64x32xbf16, #tpu.memory_space<vmem>>, vector<64x32xbf16>
    %cst_22 = arith.constant dense<0.000000e+00> : vector<8x32xf32>
    %49 = tpu.matmul %47, %48, %cst_22 {dimension_numbers = #tpu.dot_dimension_numbers<[1], [0], [0], [1], [0, 0, 1, 1], [], []>} : vector<8x64xbf16>, vector<64x32xbf16>, vector<8x32xf32> -> vector<8x32xf32>
    %c0_23 = arith.constant 0 : index
    %c0_24 = arith.constant 0 : index
    %50 = vector.load %arg5[%c0_23, %c0_24] : memref<1x32xf32, #tpu.memory_space<vmem>>, vector<1x32xf32>
    %51 = vector.broadcast %50 : vector<1x32xf32> to vector<8x32xf32>
    %52 = arith.addf %49, %51 : vector<8x32xf32>
    %53 = arith.addf %0, %52 : vector<8x32xf32>
    %cst_25 = arith.constant dense<0.000000e+00> : vector<8xf32>
    %54 = vector.multi_reduction <add>, %53, %cst_25 [1] : vector<8x32xf32> to vector<8xf32>
    %55 = vector.shape_cast %54 : vector<8xf32> to vector<8x1xf32>
    %cst_26 = arith.constant 3.200000e+01 : f32
    %56 = vector.broadcast %cst_26 : f32 to vector<8x1xf32>
    %57 = arith.divf %55, %56 : vector<8x1xf32>
    %58 = vector.broadcast %57 : vector<8x1xf32> to vector<8x32xf32>
    %59 = arith.subf %53, %58 : vector<8x32xf32>
    %60 = arith.mulf %59, %59 : vector<8x32xf32>
    %cst_27 = arith.constant dense<0.000000e+00> : vector<8xf32>
    %61 = vector.multi_reduction <add>, %60, %cst_27 [1] : vector<8x32xf32> to vector<8xf32>
    %62 = vector.shape_cast %61 : vector<8xf32> to vector<8x1xf32>
    %cst_28 = arith.constant 3.200000e+01 : f32
    %63 = vector.broadcast %cst_28 : f32 to vector<8x1xf32>
    %64 = arith.divf %62, %63 : vector<8x1xf32>
    %65 = vector.broadcast %57 : vector<8x1xf32> to vector<8x32xf32>
    %66 = arith.subf %53, %65 : vector<8x32xf32>
    %cst_29 = arith.constant 9.99999974E-6 : f32
    %67 = vector.broadcast %cst_29 : f32 to vector<8x1xf32>
    %68 = arith.addf %64, %67 : vector<8x1xf32>
    %69 = math.rsqrt %68 : vector<8x1xf32>
    %70 = vector.broadcast %69 : vector<8x1xf32> to vector<8x32xf32>
    %71 = arith.mulf %66, %70 : vector<8x32xf32>
    %c0_30 = arith.constant 0 : index
    %c0_31 = arith.constant 0 : index
    %72 = vector.load %arg6[%c0_30, %c0_31] : memref<1x32xf32, #tpu.memory_space<vmem>>, vector<1x32xf32>
    %73 = vector.broadcast %72 : vector<1x32xf32> to vector<8x32xf32>
    %74 = arith.mulf %71, %73 : vector<8x32xf32>
    %c0_32 = arith.constant 0 : index
    %c0_33 = arith.constant 0 : index
    %75 = vector.load %arg7[%c0_32, %c0_33] : memref<1x32xf32, #tpu.memory_space<vmem>>, vector<1x32xf32>
    %76 = vector.broadcast %75 : vector<1x32xf32> to vector<8x32xf32>
    %77 = arith.addf %74, %76 : vector<8x32xf32>
    %c0_34 = arith.constant 0 : index
    %c0_35 = arith.constant 0 : index
    %78 = vector.load %arg8[%c0_34, %c0_35] : memref<8x32xf32, #tpu.memory_space<vmem>>, vector<8x32xf32>
    tpu.vector_store %arg8[%c0_34, %c0_35], %77 {strides = array<i32>} : memref<8x32xf32, #tpu.memory_space<vmem>>, vector<8x32xf32>,
    return
  }
  func.func @transform_0(%arg0: i32) -> (i32, i32) {
    %c0_i32 = arith.constant 0 : i32
    %c0_i32_0 = arith.constant 0 : i32
    return %arg0, %c0_i32 : i32, i32
  }
  func.func @transform_1(%arg0: i32) -> (i32, i32) {
    %c0_i32 = arith.constant 0 : i32
    %c0_i32_0 = arith.constant 0 : i32
    %c0_i32_1 = arith.constant 0 : i32
    return %c0_i32, %c0_i32_0 : i32, i32
  }
  func.func @transform_2(%arg0: i32) -> (i32, i32) {
    %c0_i32 = arith.constant 0 : i32
    %c0_i32_0 = arith.constant 0 : i32
    %c0_i32_1 = arith.constant 0 : i32
    return %c0_i32, %c0_i32_0 : i32, i32
  }
  func.func @transform_3(%arg0: i32) -> (i32, i32) {
    %c0_i32 = arith.constant 0 : i32
    %c0_i32_0 = arith.constant 0 : i32
    %c0_i32_1 = arith.constant 0 : i32
    return %c0_i32, %c0_i32_0 : i32, i32
  }
  func.func @transform_4(%arg0: i32) -> (i32, i32) {
    %c0_i32 = arith.constant 0 : i32
    %c0_i32_0 = arith.constant 0 : i32
    %c0_i32_1 = arith.constant 0 : i32
    return %c0_i32, %c0_i32_0 : i32, i32
  }
  func.func @transform_5(%arg0: i32) -> (i32, i32) {
    %c0_i32 = arith.constant 0 : i32
    %c0_i32_0 = arith.constant 0 : i32
    %c0_i32_1 = arith.constant 0 : i32
    return %c0_i32, %c0_i32_0 : i32, i32
  }
  func.func @transform_6(%arg0: i32) -> (i32, i32) {
    %c0_i32 = arith.constant 0 : i32
    %c0_i32_0 = arith.constant 0 : i32
    %c0_i32_1 = arith.constant 0 : i32
    return %c0_i32, %c0_i32_0 : i32, i32
  }
  func.func @transform_7(%arg0: i32) -> (i32, i32) {
    %c0_i32 = arith.constant 0 : i32
    %c0_i32_0 = arith.constant 0 : i32
    return %arg0, %c0_i32 : i32, i32
  }
}

module attributes {stable_mosaic.version = 11 : i64} {
  func.func @_matmul_bias_act_kernel(%arg0: i32, %arg1: memref<8x32xf32, #tpu.memory_space<vmem>>, %arg2: memref<32x128xbf16, #tpu.memory_space<vmem>>, %arg3: memref<1x128xf32, #tpu.memory_space<vmem>>, %arg4: memref<8x128xf32, #tpu.memory_space<vmem>>) attributes {dimension_semantics = [#tpu.dimension_semantics<parallel>], iteration_bounds = array<i64: 2>, scalar_prefetch = 0 : i64, scratch_operands = 0 : i64, tpu.core_type = #tpu.core_type<tc>, window_params = [{transform_indices = @transform_0, window_bounds = array<i64: 8, 32>}, {pipeline_mode = #tpu.pipeline_mode<synchronous>, transform_indices = @transform_1, window_bounds = array<i64: 32, 128>}, {pipeline_mode = #tpu.pipeline_mode<synchronous>, transform_indices = @transform_2, window_bounds = array<i64: 1, 128>}, {transform_indices = @transform_3, window_bounds = array<i64: 8, 128>}]} {
    %c0 = arith.constant 0 : index
    %c0_0 = arith.constant 0 : index
    %0 = vector.load %arg1[%c0, %c0_0] : memref<8x32xf32, #tpu.memory_space<vmem>>, vector<8x32xf32>
    %1 = arith.truncf %0 : vector<8x32xf32> to vector<8x32xbf16>
    %c0_1 = arith.constant 0 : index
    %c0_2 = arith.constant 0 : index
    %2 = vector.load %arg2[%c0_1, %c0_2] : memref<32x128xbf16, #tpu.memory_space<vmem>>, vector<32x128xbf16>
    %cst = arith.constant dense<0.000000e+00> : vector<8x128xf32>
    %3 = tpu.matmul %1, %2, %cst {dimension_numbers = #tpu.dot_dimension_numbers<[1], [0], [0], [1], [0, 0, 1, 1], [], []>} : vector<8x32xbf16>, vector<32x128xbf16>, vector<8x128xf32> -> vector<8x128xf32>
    %c0_3 = arith.constant 0 : index
    %c0_4 = arith.constant 0 : index
    %4 = vector.load %arg3[%c0_3, %c0_4] : memref<1x128xf32, #tpu.memory_space<vmem>>, vector<1x128xf32>
    %5 = vector.broadcast %4 : vector<1x128xf32> to vector<8x128xf32>
    %6 = arith.addf %3, %5 : vector<8x128xf32>
    %cst_5 = arith.constant 0.000000e+00 : f32
    %7 = vector.broadcast %cst_5 : f32 to vector<8x128xf32>
    %8 = arith.maximumf %6, %7 : vector<8x128xf32>
    %c0_6 = arith.constant 0 : index
    %c0_7 = arith.constant 0 : index
    %9 = vector.load %arg4[%c0_6, %c0_7] : memref<8x128xf32, #tpu.memory_space<vmem>>, vector<8x128xf32>
    tpu.vector_store %arg4[%c0_6, %c0_7], %8 {strides = array<i32>} : memref<8x128xf32, #tpu.memory_space<vmem>>, vector<8x128xf32>,
    return
  }
  func.func @transform_0(%arg0: i32) -> (i32, i32) {
    %c0_i32 = arith.constant 0 : i32
    %c0_i32_0 = arith.constant 0 : i32
    return %arg0, %c0_i32 : i32, i32
  }
  func.func @transform_1(%arg0: i32) -> (i32, i32) {
    %c0_i32 = arith.constant 0 : i32
    %c0_i32_0 = arith.constant 0 : i32
    %c0_i32_1 = arith.constant 0 : i32
    return %c0_i32, %c0_i32_0 : i32, i32
  }
  func.func @transform_2(%arg0: i32) -> (i32, i32) {
    %c0_i32 = arith.constant 0 : i32
    %c0_i32_0 = arith.constant 0 : i32
    %c0_i32_1 = arith.constant 0 : i32
    return %c0_i32, %c0_i32_0 : i32, i32
  }
  func.func @transform_3(%arg0: i32) -> (i32, i32) {
    %c0_i32 = arith.constant 0 : i32
    %c0_i32_0 = arith.constant 0 : i32
    return %arg0, %c0_i32 : i32, i32
  }
}

module attributes {stable_mosaic.version = 11 : i64} {
  func.func @_conv1d_kernel(%arg0: i32, %arg1: memref<1x36x32xf32, #tpu.memory_space<vmem>>, %arg2: memref<160x32xbf16, #tpu.memory_space<vmem>>, %arg3: memref<1x32xf32, #tpu.memory_space<vmem>>, %arg4: memref<1x32x32xf32, #tpu.memory_space<vmem>>) attributes {dimension_semantics = [#tpu.dimension_semantics<parallel>], iteration_bounds = array<i64: 2>, scalar_prefetch = 0 : i64, scratch_operands = 0 : i64, tpu.core_type = #tpu.core_type<tc>, window_params = [{transform_indices = @transform_0, window_bounds = array<i64: 1, 36, 32>}, {pipeline_mode = #tpu.pipeline_mode<synchronous>, transform_indices = @transform_1, window_bounds = array<i64: 160, 32>}, {pipeline_mode = #tpu.pipeline_mode<synchronous>, transform_indices = @transform_2, window_bounds = array<i64: 1, 32>}, {transform_indices = @transform_3, window_bounds = array<i64: 1, 32, 32>}]} {
    %c0 = arith.constant 0 : index
    %c0_0 = arith.constant 0 : index
    %c0_1 = arith.constant 0 : index
    %0 = vector.load %arg1[%c0, %c0_0, %c0_1] : memref<1x36x32xf32, #tpu.memory_space<vmem>>, vector<1x36x32xf32>
    %1 = vector.shape_cast %0 : vector<1x36x32xf32> to vector<36x32xf32>
    %2 = vector.extract_strided_slice %1 {offsets = [0, 0], sizes = [32, 32], strides = [1, 1]} : vector<36x32xf32> to vector<32x32xf32>
    %3 = vector.extract_strided_slice %1 {offsets = [1, 0], sizes = [32, 32], strides = [1, 1]} : vector<36x32xf32> to vector<32x32xf32>
    %4 = vector.extract_strided_slice %1 {offsets = [2, 0], sizes = [32, 32], strides = [1, 1]} : vector<36x32xf32> to vector<32x32xf32>
    %5 = vector.extract_strided_slice %1 {offsets = [3, 0], sizes = [32, 32], strides = [1, 1]} : vector<36x32xf32> to vector<32x32xf32>
    %6 = vector.extract_strided_slice %1 {offsets = [4, 0], sizes = [32, 32], strides = [1, 1]} : vector<36x32xf32> to vector<32x32xf32>
    %7 = tpu.concatenate %2, %3, %4, %5, %6 in 1 : vector<32x32xf32>, vector<32x32xf32>, vector<32x32xf32>, vector<32x32xf32>, vector<32x32xf32> -> vector<32x160xf32>
    %8 = arith.truncf %7 : vector<32x160xf32> to vector<32x160xbf16>
    %c0_2 = arith.constant 0 : index
    %c0_3 = arith.constant 0 : index
    %9 = vector.load %arg2[%c0_2, %c0_3] : memref<160x32xbf16, #tpu.memory_space<vmem>>, vector<160x32xbf16>
    %cst = arith.constant dense<0.000000e+00> : vector<32x32xf32>
    %10 = tpu.matmul %8, %9, %cst {dimension_numbers = #tpu.dot_dimension_numbers<[1], [0], [0], [1], [0, 0, 1, 1], [], []>} : vector<32x160xbf16>, vector<160x32xbf16>, vector<32x32xf32> -> vector<32x32xf32>
    %c0_4 = arith.constant 0 : index
    %c0_5 = arith.constant 0 : index
    %11 = vector.load %arg3[%c0_4, %c0_5] : memref<1x32xf32, #tpu.memory_space<vmem>>, vector<1x32xf32>
    %12 = vector.broadcast %11 : vector<1x32xf32> to vector<32x32xf32>
    %13 = arith.addf %10, %12 : vector<32x32xf32>
    %cst_6 = arith.constant 0.000000e+00 : f32
    %14 = vector.broadcast %cst_6 : f32 to vector<32x32xf32>
    %15 = arith.maximumf %13, %14 : vector<32x32xf32>
    %c0_7 = arith.constant 0 : index
    %c0_8 = arith.constant 0 : index
    %c0_9 = arith.constant 0 : index
    %16 = vector.load %arg4[%c0_7, %c0_8, %c0_9] : memref<1x32x32xf32, #tpu.memory_space<vmem>>, vector<1x32x32xf32>
    %17 = vector.shape_cast %16 : vector<1x32x32xf32> to vector<32x32xf32>
    %18 = vector.shape_cast %15 : vector<32x32xf32> to vector<1x32x32xf32>
    tpu.vector_store %arg4[%c0_7, %c0_8, %c0_9], %18 {strides = array<i32>} : memref<1x32x32xf32, #tpu.memory_space<vmem>>, vector<1x32x32xf32>,
    return
  }
  func.func @transform_0(%arg0: i32) -> (i32, i32, i32) {
    %c0_i32 = arith.constant 0 : i32
    %c0_i32_0 = arith.constant 0 : i32
    %c0_i32_1 = arith.constant 0 : i32
    return %arg0, %c0_i32, %c0_i32_0 : i32, i32, i32
  }
  func.func @transform_1(%arg0: i32) -> (i32, i32) {
    %c0_i32 = arith.constant 0 : i32
    %c0_i32_0 = arith.constant 0 : i32
    %c0_i32_1 = arith.constant 0 : i32
    return %c0_i32, %c0_i32_0 : i32, i32
  }
  func.func @transform_2(%arg0: i32) -> (i32, i32) {
    %c0_i32 = arith.constant 0 : i32
    %c0_i32_0 = arith.constant 0 : i32
    %c0_i32_1 = arith.constant 0 : i32
    return %c0_i32, %c0_i32_0 : i32, i32
  }
  func.func @transform_3(%arg0: i32) -> (i32, i32, i32) {
    %c0_i32 = arith.constant 0 : i32
    %c0_i32_0 = arith.constant 0 : i32
    %c0_i32_1 = arith.constant 0 : i32
    return %arg0, %c0_i32, %c0_i32_0 : i32, i32, i32
  }
}

module attributes {stable_mosaic.version = 11 : i64} {
  func.func @_conv1d_kernel(%arg0: i32, %arg1: memref<1x34x32xf32, #tpu.memory_space<vmem>>, %arg2: memref<96x16xbf16, #tpu.memory_space<vmem>>, %arg3: memref<1x16xf32, #tpu.memory_space<vmem>>, %arg4: memref<1x32x16xf32, #tpu.memory_space<vmem>>) attributes {dimension_semantics = [#tpu.dimension_semantics<parallel>], iteration_bounds = array<i64: 2>, scalar_prefetch = 0 : i64, scratch_operands = 0 : i64, tpu.core_type = #tpu.core_type<tc>, window_params = [{transform_indices = @transform_0, window_bounds = array<i64: 1, 34, 32>}, {pipeline_mode = #tpu.pipeline_mode<synchronous>, transform_indices = @transform_1, window_bounds = array<i64: 96, 16>}, {pipeline_mode = #tpu.pipeline_mode<synchronous>, transform_indices = @transform_2, window_bounds = array<i64: 1, 16>}, {transform_indices = @transform_3, window_bounds = array<i64: 1, 32, 16>}]} {
    %c0 = arith.constant 0 : index
    %c0_0 = arith.constant 0 : index
    %c0_1 = arith.constant 0 : index
    %0 = vector.load %arg1[%c0, %c0_0, %c0_1] : memref<1x34x32xf32, #tpu.memory_space<vmem>>, vector<1x34x32xf32>
    %1 = vector.shape_cast %0 : vector<1x34x32xf32> to vector<34x32xf32>
    %2 = vector.extract_strided_slice %1 {offsets = [0, 0], sizes = [32, 32], strides = [1, 1]} : vector<34x32xf32> to vector<32x32xf32>
    %3 = vector.extract_strided_slice %1 {offsets = [1, 0], sizes = [32, 32], strides = [1, 1]} : vector<34x32xf32> to vector<32x32xf32>
    %4 = vector.extract_strided_slice %1 {offsets = [2, 0], sizes = [32, 32], strides = [1, 1]} : vector<34x32xf32> to vector<32x32xf32>
    %5 = tpu.concatenate %2, %3, %4 in 1 : vector<32x32xf32>, vector<32x32xf32>, vector<32x32xf32> -> vector<32x96xf32>
    %6 = arith.truncf %5 : vector<32x96xf32> to vector<32x96xbf16>
    %c0_2 = arith.constant 0 : index
    %c0_3 = arith.constant 0 : index
    %7 = vector.load %arg2[%c0_2, %c0_3] : memref<96x16xbf16, #tpu.memory_space<vmem>>, vector<96x16xbf16>
    %cst = arith.constant dense<0.000000e+00> : vector<32x16xf32>
    %8 = tpu.matmul %6, %7, %cst {dimension_numbers = #tpu.dot_dimension_numbers<[1], [0], [0], [1], [0, 0, 1, 1], [], []>} : vector<32x96xbf16>, vector<96x16xbf16>, vector<32x16xf32> -> vector<32x16xf32>
    %c0_4 = arith.constant 0 : index
    %c0_5 = arith.constant 0 : index
    %9 = vector.load %arg3[%c0_4, %c0_5] : memref<1x16xf32, #tpu.memory_space<vmem>>, vector<1x16xf32>
    %10 = vector.broadcast %9 : vector<1x16xf32> to vector<32x16xf32>
    %11 = arith.addf %8, %10 : vector<32x16xf32>
    %cst_6 = arith.constant 0.000000e+00 : f32
    %12 = vector.broadcast %cst_6 : f32 to vector<32x16xf32>
    %13 = arith.maximumf %11, %12 : vector<32x16xf32>
    %c0_7 = arith.constant 0 : index
    %c0_8 = arith.constant 0 : index
    %c0_9 = arith.constant 0 : index
    %14 = vector.load %arg4[%c0_7, %c0_8, %c0_9] : memref<1x32x16xf32, #tpu.memory_space<vmem>>, vector<1x32x16xf32>
    %15 = vector.shape_cast %14 : vector<1x32x16xf32> to vector<32x16xf32>
    %16 = vector.shape_cast %13 : vector<32x16xf32> to vector<1x32x16xf32>
    tpu.vector_store %arg4[%c0_7, %c0_8, %c0_9], %16 {strides = array<i32>} : memref<1x32x16xf32, #tpu.memory_space<vmem>>, vector<1x32x16xf32>,
    return
  }
  func.func @transform_0(%arg0: i32) -> (i32, i32, i32) {
    %c0_i32 = arith.constant 0 : i32
    %c0_i32_0 = arith.constant 0 : i32
    %c0_i32_1 = arith.constant 0 : i32
    return %arg0, %c0_i32, %c0_i32_0 : i32, i32, i32
  }
  func.func @transform_1(%arg0: i32) -> (i32, i32) {
    %c0_i32 = arith.constant 0 : i32
    %c0_i32_0 = arith.constant 0 : i32
    %c0_i32_1 = arith.constant 0 : i32
    return %c0_i32, %c0_i32_0 : i32, i32
  }
  func.func @transform_2(%arg0: i32) -> (i32, i32) {
    %c0_i32 = arith.constant 0 : i32
    %c0_i32_0 = arith.constant 0 : i32
    %c0_i32_1 = arith.constant 0 : i32
    return %c0_i32, %c0_i32_0 : i32, i32
  }
  func.func @transform_3(%arg0: i32) -> (i32, i32, i32) {
    %c0_i32 = arith.constant 0 : i32
    %c0_i32_0 = arith.constant 0 : i32
    %c0_i32_1 = arith.constant 0 : i32
    return %arg0, %c0_i32, %c0_i32_0 : i32, i32, i32
  }
}

module attributes {stable_mosaic.version = 11 : i64} {
  func.func @_conv1d_kernel(%arg0: i32, %arg1: memref<1x34x16xf32, #tpu.memory_space<vmem>>, %arg2: memref<2x48xbf16, #tpu.memory_space<vmem>>, %arg3: memref<2x1xf32, #tpu.memory_space<vmem>>, %arg4: memref<1x2x32xf32, #tpu.memory_space<vmem>>) attributes {dimension_semantics = [#tpu.dimension_semantics<parallel>], iteration_bounds = array<i64: 2>, scalar_prefetch = 0 : i64, scratch_operands = 0 : i64, tpu.core_type = #tpu.core_type<tc>, window_params = [{transform_indices = @transform_0, window_bounds = array<i64: 1, 34, 16>}, {pipeline_mode = #tpu.pipeline_mode<synchronous>, transform_indices = @transform_1, window_bounds = array<i64: 2, 48>}, {pipeline_mode = #tpu.pipeline_mode<synchronous>, transform_indices = @transform_2, window_bounds = array<i64: 2, 1>}, {transform_indices = @transform_3, window_bounds = array<i64: 1, 2, 32>}]} {
    %c0 = arith.constant 0 : index
    %c0_0 = arith.constant 0 : index
    %c0_1 = arith.constant 0 : index
    %0 = vector.load %arg1[%c0, %c0_0, %c0_1] : memref<1x34x16xf32, #tpu.memory_space<vmem>>, vector<1x34x16xf32>
    %1 = vector.shape_cast %0 : vector<1x34x16xf32> to vector<34x16xf32>
    %2 = vector.extract_strided_slice %1 {offsets = [0, 0], sizes = [32, 16], strides = [1, 1]} : vector<34x16xf32> to vector<32x16xf32>
    %3 = vector.extract_strided_slice %1 {offsets = [1, 0], sizes = [32, 16], strides = [1, 1]} : vector<34x16xf32> to vector<32x16xf32>
    %4 = vector.extract_strided_slice %1 {offsets = [2, 0], sizes = [32, 16], strides = [1, 1]} : vector<34x16xf32> to vector<32x16xf32>
    %5 = tpu.concatenate %2, %3, %4 in 1 : vector<32x16xf32>, vector<32x16xf32>, vector<32x16xf32> -> vector<32x48xf32>
    %6 = arith.truncf %5 : vector<32x48xf32> to vector<32x48xbf16>
    %c0_2 = arith.constant 0 : index
    %c0_3 = arith.constant 0 : index
    %7 = vector.load %arg2[%c0_2, %c0_3] : memref<2x48xbf16, #tpu.memory_space<vmem>>, vector<2x48xbf16>
    %cst = arith.constant dense<0.000000e+00> : vector<2x32xf32>
    %8 = tpu.matmul %7, %6, %cst {dimension_numbers = #tpu.dot_dimension_numbers<[1], [1], [0], [0], [0, 0, 1, 0], [], []>} : vector<2x48xbf16>, vector<32x48xbf16>, vector<2x32xf32> -> vector<2x32xf32>
    %c0_4 = arith.constant 0 : index
    %c0_5 = arith.constant 0 : index
    %9 = vector.load %arg3[%c0_4, %c0_5] : memref<2x1xf32, #tpu.memory_space<vmem>>, vector<2x1xf32>
    %10 = vector.broadcast %9 : vector<2x1xf32> to vector<2x32xf32>
    %11 = arith.addf %8, %10 : vector<2x32xf32>
    %c0_6 = arith.constant 0 : index
    %c0_7 = arith.constant 0 : index
    %c0_8 = arith.constant 0 : index
    %12 = vector.load %arg4[%c0_6, %c0_7, %c0_8] : memref<1x2x32xf32, #tpu.memory_space<vmem>>, vector<1x2x32xf32>
    %13 = vector.shape_cast %12 : vector<1x2x32xf32> to vector<2x32xf32>
    %14 = vector.shape_cast %11 : vector<2x32xf32> to vector<1x2x32xf32>
    tpu.vector_store %arg4[%c0_6, %c0_7, %c0_8], %14 {strides = array<i32>} : memref<1x2x32xf32, #tpu.memory_space<vmem>>, vector<1x2x32xf32>,
    return
  }
  func.func @transform_0(%arg0: i32) -> (i32, i32, i32) {
    %c0_i32 = arith.constant 0 : i32
    %c0_i32_0 = arith.constant 0 : i32
    %c0_i32_1 = arith.constant 0 : i32
    return %arg0, %c0_i32, %c0_i32_0 : i32, i32, i32
  }
  func.func @transform_1(%arg0: i32) -> (i32, i32) {
    %c0_i32 = arith.constant 0 : i32
    %c0_i32_0 = arith.constant 0 : i32
    %c0_i32_1 = arith.constant 0 : i32
    return %c0_i32, %c0_i32_0 : i32, i32
  }
  func.func @transform_2(%arg0: i32) -> (i32, i32) {
    %c0_i32 = arith.constant 0 : i32
    %c0_i32_0 = arith.constant 0 : i32
    %c0_i32_1 = arith.constant 0 : i32
    return %c0_i32, %c0_i32_0 : i32, i32
  }
  func.func @transform_3(%arg0: i32) -> (i32, i32, i32) {
    %c0_i32 = arith.constant 0 : i32
    %c0_i32_0 = arith.constant 0 : i32
    %c0_i32_1 = arith.constant 0 : i32
    return %arg0, %c0_i32, %c0_i32_0 : i32, i32, i32
  }
}

</mosaic_0001>

<bundles_post_ra>
// kernel: signal_decomposition_transformer.14
= control target key start
LH: loop header
LB: loop body
LE: loop exit
PB: predicated region body
PF: predicated region fallthrough
CT: control target
= control target key end

     0   :  { %s375_s12 = smov 0   ;;  %s402_s0 = inlined_call_operand.vmem [shape: f32[2,10,1], index: 0, kind: input, shape index: {}]   ;;  %s403_s1 = inlined_call_operand.vmem [shape: bf16[3,16], index: 1, kind: input, shape index: {}]   ;;  %s404_s2 = inlined_call_operand.vmem [shape: f32[1,16], index: 2, kind: input, shape index: {}]   ;;  %s405_s3 = inlined_call_operand.vmem [shape: f32[2,8,16], index: 3, kind: output, shape index: {}]  }
   0x1 LB: > { %s308_s13 = sadd.s32 4294967295, %s348_s12   ;;  %p312_p0 = scmp.ge.s32.totalorder %s348_s12, 1  ;;  %s348_s12 = sphi %s375_s12, %s13_s12  }
   0x2   : > { %p137_p1 = scmp.lt.s32.totalorder %s348_s12, 3 }
   0x4   : > { %p138_p2 = pnand %p312_p0, %p137_p1 }
   0x5   : > { %p160_p3 = scmp.lt.s32.totalorder (!%p138_p2), %s308_s13, 1  ;;  %v350_v0 = vmov (!%p138_p2), 0.0   ;;  %vm205_vm0 = vcmask (!%p138_p2), 1040384   ;;  %vm206_vm1 = vcmask (!%p138_p2), 1041408   ;;  %v193_v1 = vld [vmem:[%s403_s1] sm:$0x3] (!%p138_p2) }
   0x6   : > { %141 = sbr.rel (%p138_p2) target bundleno = 359 (0x167), region = 32  ;;  %323 = vmatprep.subr.bf16.mxu0 (!%p138_p2), %v350_v0  ;;  %v351_v2 = vmov (!%p138_p2), 65535   ;;  %vm352_vm2 = vmmov (!%p138_p2), 0   ;;  %vm174_vm3 = vcmask (!%p138_p2), 1046528   ;;  %vm181_vm4 = vcmask (!%p138_p2), 1045504   ;;  %s353_s20 = smov (!%p138_p2), 1  }
   0x7   : > { %v207_v3 = vsel (!%p138_p2), %vm205_vm0, 4294967295, %v351_v2  ;;  %325 = vmatprep.mubr.msk.bf16.mxu0 (!%p138_p2), %vm352_vm2, %v350_v0  ;;  %s354_s21 = smov (!%p138_p2), 2   ;;  %vm188_vm5 = vcmask (!%p138_p2), 7168   ;;  %vm190_vm6 = vcmask (!%p138_p2), 15360   ;;  %vm201_vm7 = vcmask (!%p138_p2), 23552  }
   0x8   : > { %v208_v4 = vsel (!%p138_p2), %vm206_vm1, %v207_v3, 0  ;;  %v316_v19 = vld [vmem:[%s404_s2] ss:$0 sm:$0xff] (!%p138_p2)  ;;  %vm253_vm8 = vcmask (!%p138_p2), 130048  }
   0x9   : > { %v210_v5 = vand.u32 (!%p138_p2), %v208_v4, %v193_v1 }
   0xb   : > { %324 = vmatpush3.bf16.msra.mxu0 (!%p138_p2), %v210_v5 }
   0xd   : > { %s407_s13 = smov (!%p160_p3, %s308_s13), 1 }
   0xe   : > { %s320_s16 = sshll.u32 %s407_s13, 4  ;;  %s315_s24 = sshll.u32 %s407_s13, 3 }
   0xf   : > { %s164_s19 = scalar_lea.vmem %s402_s0, %s320_s16  ;;  %s168_s27 = scalar_lea.vmem %s405_s3, %s315_s24 }
  0x10   : > { %v170_v6 = vld [vmem:[%s164_s19] sm:$0xff]  ;;  %v171_v7 = vld [vmem:[%s164_s19 + $0x8] sm:$0x3] }
  0x11   : > { %v175_v8 = vrot.slane %v170_v6, 1  ;;  %v176_v9 = vrot.slane %v171_v7, 1  ;;  %v182_v10 = vrot.slane %v170_v6, 2  ;;  %v183_v11 = vrot.slane %v171_v7, 2 }
  0x13   : > { %v177_v12 = vsel %vm174_vm3, %v175_v8, %v176_v9  ;;  %v184_v13 = vsel %vm181_vm4, %v182_v10, %v183_v11 }
  0x14   : > { %178 = vrot.lane.b32.xlu0 %v177_v12, %s353_s20 }
  0x18   : > { %185 = vrot.lane.b32.xlu0 %v184_v13, %s354_s21 }
  0x86   : > { %v179_v14 = vpop.permute.xlu0 %178 }
  0x87   : > { %v189_v15 = vsel %vm188_vm5, %v170_v6, %v179_v14 }
  0x8a   : > { %v186_v16 = vpop.permute.xlu0 %185 }
  0x8b   : > { %v191_v17 = vsel %vm190_vm6, %v189_v15, %v186_v16 }
  0x8c   : > { %v192_v18 = vpack.c.bf16 %v191_v17, %v191_v17 }
  0x8e   : > { %326 = vmatmul.mubr.msk.bf16.vlgmr.msra.gmra.mrb[0].mxu0 %vm201_vm7, %v192_v18 }
 0x161   : > { %v246_v20 = vpop.f32.mrb[0].mxu0 }
 0x162   : > { %v247_v21 = vadd.f32 %v316_v19, %v246_v20  ;;  %v327_v22 = vpop.f32.mrb[1].mxu0 }
 0x163   : > { %v249_v23 = vpop.f32.mrb[2].mxu0 }
 0x164   : > { %v252_v24 = vmax.f32 %v247_v21, 0.0  ;;  %v328_v25 = vpop.f32.mrb[3].mxu0 }
 0x166   : > { %254 = vst.msk [vmem:[%s168_s27] sm:$0xff] %vm253_vm8, %v252_v24 }
 0x167 PF: > { %s13_s12 = sadd.s32 1, %s348_s12  }
 0x168   : > { %p10_p4 = scmp.ge.s32.totalorder %s13_s12, 4  }
 0x16a   :  { %12 = sbr.rel (!%p10_p4) target bundleno = 1 (0x1), region = 62 }

// kernel: signal_decomposition_transformer.15
= control target key start
LH: loop header
LB: loop body
LE: loop exit
PB: predicated region body
PF: predicated region fallthrough
CT: control target
= control target key end

     0   :  { %s433_s15 = smov 0   ;;  %s471_s0 = inlined_call_operand.vmem [shape: f32[2,10,16], index: 0, kind: input, shape index: {}]   ;;  %s472_s1 = inlined_call_operand.vmem [shape: bf16[48,32], index: 1, kind: input, shape index: {}]   ;;  %s473_s2 = inlined_call_operand.vmem [shape: f32[1,32], index: 2, kind: input, shape index: {}]   ;;  %s474_s3 = inlined_call_operand.vmem [shape: f32[8,32], index: 3, kind: input, shape index: {}]   ;;  %s475_s4 = inlined_call_operand.vmem [shape: f32[2,8,32], index: 4, kind: output, shape index: {}]  }
   0x1 LB: > { %s351_s16 = sadd.s32 4294967295, %s402_s15   ;;  %p355_p0 = scmp.ge.s32.totalorder %s402_s15, 1  ;;  %s402_s15 = sphi %s433_s15, %s14_s15  }
   0x2   : > { %p162_p1 = scmp.lt.s32.totalorder %s402_s15, 3 }
   0x4   : > { %p163_p2 = pnand %p355_p0, %p162_p1 }
   0x5   : > { %p187_p3 = scmp.lt.s32.totalorder (!%p163_p2), %s351_s16, 1  ;;  %v393_v0 = vld [vmem:[%s472_s1] sm:$0xff] (!%p163_p2)   ;;  %v404_v1 = vmov (!%p163_p2), 0.0   ;;  %v394_v2 = vld [vmem:[%s472_s1 + $0x8] sm:$0xff] (!%p163_p2)   ;;  %vm405_vm0 = vmmov (!%p163_p2), 0   ;;  %vm201_vm1 = vcmask (!%p163_p2), 1046528  }
   0x6   : > { %166 = sbr.rel (%p163_p2) target bundleno = 359 (0x167), region = 36  ;;  %371 = vmatprep.subr.bf16.mxu0 (!%p163_p2), %v404_v1  ;;  %377 = vmatprep.mubr.msk.bf16.mxu0 (!%p163_p2), %vm405_vm0, %v404_v1  ;;  %v395_v5 = vld [vmem:[%s472_s1 + $0x10] sm:$0xff] (!%p163_p2)   ;;  %vm208_vm2 = vcmask (!%p163_p2), 1045504   ;;  %s406_s27 = smov (!%p163_p2), 16   ;;  %vm215_vm3 = vcmask (!%p163_p2), 130048   ;;  %vm217_vm4 = vcmask (!%p163_p2), 261120  }
   0x7   : > { %372 = vmatpush3.bf16.msra.mxu0 (!%p163_p2), %v393_v0  ;;  %s407_s28 = smov (!%p163_p2), 32   ;;  %vm251_vm5 = vcmask (!%p163_p2), 392192   ;;  %v359_v17 = vld [vmem:[%s473_s2] ss:$0 sm:$0xff] (!%p163_p2) }
   0x8   : > { %373 = vmatprep.subr.bf16.mxu0 (!%p163_p2), %v404_v1  ;;  %v295_v19 = vld [vmem:[%s474_s3] sm:$0xff] (!%p163_p2) }
   0xb   : > { %374 = vmatpush3.bf16.msra.mxu0 (!%p163_p2), %v394_v2 }
   0xc   : > { %375 = vmatprep.subr.bf16.mxu0 (!%p163_p2), %v404_v1 }
   0xd   : > { %s477_s16 = smov (!%p187_p3, %s351_s16), 1 }
   0xe   : > { %s366_s21 = sshll.u32 %s477_s16, 4  ;;  %s358_s5 = sshll.u32 %s477_s16, 3 }
   0xf   : > { %s191_s24 = scalar_lea.vmem %s471_s0, %s366_s21  ;;  %376 = vmatpush3.bf16.msra.mxu0 %v395_v5  ;;  %s195_s10 = scalar_lea.vmem %s475_s4, %s358_s5 }
  0x10   : > { %v197_v3 = vld [vmem:[%s191_s24] sm:$0xff]  ;;  %v198_v4 = vld [vmem:[%s191_s24 + $0x8] sm:$0x3] }
  0x11   : > { %v202_v6 = vrot.slane %v197_v3, 1  ;;  %v203_v7 = vrot.slane %v198_v4, 1  ;;  %v209_v8 = vrot.slane %v197_v3, 2  ;;  %v210_v9 = vrot.slane %v198_v4, 2 }
  0x13   : > { %v204_v10 = vsel %vm201_vm1, %v202_v6, %v203_v7  ;;  %v211_v11 = vsel %vm208_vm2, %v209_v8, %v210_v9 }
  0x14   : > { %205 = vrot.lane.b32.xlu0 %v204_v10, %s406_s27 }
  0x18   : > { %212 = vrot.lane.b32.xlu0 %v211_v11, %s407_s28 }
  0x86   : > { %v206_v12 = vpop.permute.xlu0 %205 }
  0x87   : > { %v216_v13 = vsel %vm215_vm3, %v197_v3, %v206_v12 }
  0x8a   : > { %v213_v14 = vpop.permute.xlu0 %212 }
  0x8b   : > { %v218_v15 = vsel %vm217_vm4, %v216_v13, %v213_v14 }
  0x8c   : > { %v219_v16 = vpack.c.bf16 %v218_v15, %v218_v15 }
  0x8e   : > { %378 = vmatmul.mubr.msk.bf16.vlgmr.msra.gmra.mrb[0].mxu0 %vm251_vm5, %v219_v16 }
 0x161   : > { %v289_v18 = vpop.f32.mrb[0].mxu0 }
 0x162   : > { %v290_v20 = vadd.f32 %v359_v17, %v289_v18  ;;  %v379_v21 = vpop.f32.mrb[1].mxu0 }
 0x163   : > { %v292_v22 = vpop.f32.mrb[2].mxu0 }
 0x164   : > { %v296_v23 = vadd.f32 %v295_v19, %v290_v20  ;;  %v380_v24 = vpop.f32.mrb[3].mxu0 }
 0x166   : > { %297 = vst.msk [vmem:[%s195_s10] sm:$0xff] %vm217_vm4, %v296_v23 }
 0x167 PF: > { %s14_s15 = sadd.s32 1, %s402_s15  }
 0x168   : > { %p11_p4 = scmp.ge.s32.totalorder %s14_s15, 4  }
 0x16a   :  { %13 = sbr.rel (!%p11_p4) target bundleno = 1 (0x1), region = 66 }

// kernel: signal_decomposition_transformer.16
= control target key start
LH: loop header
LB: loop body
LE: loop exit
PB: predicated region body
PF: predicated region fallthrough
CT: control target
= control target key end

     0   :  { %s358_s12 = smov 0   ;;  %s384_s0 = inlined_call_operand.vmem [shape: f32[16,32], index: 0, kind: input, shape index: {}]   ;;  %s385_s1 = inlined_call_operand.vmem [shape: bf16[32,96], index: 1, kind: input, shape index: {}]   ;;  %s386_s2 = inlined_call_operand.vmem [shape: f32[1,96], index: 2, kind: input, shape index: {}]   ;;  %s387_s3 = inlined_call_operand.vmem [shape: bf16[16,96], index: 3, kind: output, shape index: {}]  }
   0x1 LB: > { %s292_s13 = sadd.s32 4294967295, %s334_s12   ;;  %p296_p0 = scmp.ge.s32.totalorder %s334_s12, 1  ;;  %s334_s12 = sphi %s358_s12, %s13_s12  }
   0x2   : > { %p136_p1 = scmp.lt.s32.totalorder %s334_s12, 3 }
   0x4   : > { %p137_p2 = pnand %p296_p0, %p136_p1 }
   0x5   : > { %v326_v0 = vld [vmem:[%s385_s1] sm:$0xff] (!%p137_p2)   ;;  %v336_v1 = vmov (!%p137_p2), 0.0   ;;  %v327_v2 = vld [vmem:[%s385_s1 + $0x8] sm:$0xff] (!%p137_p2)   ;;  %vm337_vm0 = vmmov (!%p137_p2), 0   ;;  %p158_p3 = scmp.lt.s32.totalorder (!%p137_p2), %s292_s13, 1  ;;  %vm192_vm1 = vcmask (!%p137_p2), 261120  }
   0x6   : > { %140 = sbr.rel (%p137_p2) target bundleno = 236 (0xec), region = 32  ;;  %308 = vmatprep.subr.bf16.mxu0 (!%p137_p2), %v336_v1  ;;  %312 = vmatprep.mubr.msk.bf16.mxu0 (!%p137_p2), %vm337_vm0, %v336_v1  ;;  %v299_v5 = vld [vmem:[%s386_s2] ss:$0 sm:$0xff] (!%p137_p2)  ;;  %vm237_vm2 = vcmask (!%p137_p2), 781312  }
   0x7   : > { %309 = vmatpush3.bf16.msra.mxu0 (!%p137_p2), %v326_v0 }
   0x8   : > { %310 = vmatprep.subr.bf16.mxu0 (!%p137_p2), %v336_v1 }
   0xb   : > { %311 = vmatpush3.bf16.msra.mxu0 (!%p137_p2), %v327_v2 }
   0xd   : > { %s389_s13 = smov (!%p158_p3, %s292_s13), 1 }
   0xe   : > { %s297_s18 = sshll.u32 %s389_s13, 3  ;;  %s298_s24 = sshll.u32 %s389_s13, 2 }
   0xf   : > { %s161_s21 = scalar_lea.vmem %s384_s0, %s297_s18  ;;  %s165_s27 = scalar_lea.vmem %s387_s3, %s298_s24 }
  0x10   : > { %v167_v3 = vld [vmem:[%s161_s21] sm:$0xff] }
  0x11   : > { %v168_v4 = vpack.c.bf16 %v167_v3, %v167_v3 }
  0x13   : > { %313 = vmatmul.mubr.msk.bf16.vlgmr.msra.gmra.mrb[0].mxu0 %vm192_vm1, %v168_v4 }
  0xe6   : > { %v230_v6 = vpop.f32.mrb[0].mxu0 }
  0xe7   : > { %v231_v7 = vadd.f32 %v299_v5, %v230_v6  ;;  %v314_v8 = vpop.f32.mrb[1].mxu0 }
  0xe8   : > { %v233_v9 = vpop.f32.mrb[2].mxu0 }
  0xe9   : > { %v236_v10 = vpack.c.bf16 %v231_v7, %v231_v7  ;;  %v315_v11 = vpop.f32.mrb[3].mxu0 }
  0xeb   : > { %238 = vst.msk [vmem:[%s165_s27] sm:$0xf] %vm237_vm2, %v236_v10 }
  0xec PF: > { %s13_s12 = sadd.s32 1, %s334_s12  }
  0xed   : > { %p10_p4 = scmp.ge.s32.totalorder %s13_s12, 4  }
  0xef   :  { %12 = sbr.rel (!%p10_p4) target bundleno = 1 (0x1), region = 62 }

// kernel: signal_decomposition_transformer.17
= control target key start
LH: loop header
LB: loop body
LE: loop exit
PB: predicated region body
PF: predicated region fallthrough
CT: control target
= control target key end

     0   :  { %s787_s6 = smov 0   ;;  %s881_s0 = inlined_call_operand.vmem [shape: bf16[16,96], index: 0, kind: input, shape index: {}]   ;;  %s882_s1 = inlined_call_operand.vmem [shape: bf16[16,32], index: 1, kind: output, shape index: {}]  }
   0x1 LB: > { %s630_s7 = sadd.s32 4294967295, %s759_s6   ;;  %p634_p0 = scmp.ge.s32.totalorder %s759_s6, 1  ;;  %s759_s6 = sphi %s787_s6, %s11_s6  }
   0x2   : > { %p86_p1 = scmp.lt.s32.totalorder %s759_s6, 3 }
   0x4   : > { %p87_p2 = pnand %p634_p0, %p86_p1 }
   0x5   : > { %p104_p3 = scmp.lt.s32.totalorder (!%p87_p2), %s630_s7, 1  ;;  %v761_v0 = vmov (!%p87_p2), 0.0   ;;  %vm762_vm0 = vmmov (!%p87_p2), 0   ;;  %s763_s12 = smov (!%p87_p2), 96   ;;  %vm119_vm1 = vcmask (!%p87_p2), 64512   ;;  %vm181_vm2 = vcmask (!%p87_p2), 1043456  }
   0x6   : > { %90 = sbr.rel (%p87_p2) target bundleno = 1243 (0x4db), region = 24  ;;  %664 = vmatprep.subr.bf16.mxu0 (!%p87_p2), %v761_v0  ;;  %666 = vmatprep.mubr.msk.bf16.mxu0 (!%p87_p2), %vm762_vm0, %v761_v0  ;;  %s764_s13 = smov (!%p87_p2), 64   ;;  %vm570_vm3 = vcmask (!%p87_p2), 130048   ;;  %vm572_vm4 = vcmask (!%p87_p2), 195584   ;;  %vm575_vm5 = vcmask (!%p87_p2), 257024  }
   0x7   : > { %670 = vmatprep.subr.bf16.mxu1 (!%p87_p2), %v761_v0  ;;  %672 = vmatprep.mubr.msk.bf16.mxu1 (!%p87_p2), %vm762_vm0, %v761_v0  ;;  %s765_s14 = smov (!%p87_p2), 88   ;;  %s766_s15 = smov (!%p87_p2), 120  }
   0x8   : > { %s767_s16 = smov (!%p87_p2), 80   ;;  %s768_s17 = smov (!%p87_p2), 112  }
   0x9   : > { %s769_s18 = smov (!%p87_p2), 72   ;;  %s770_s19 = smov (!%p87_p2), 104  }
   0xa   : > { %s771_s20 = smov (!%p87_p2), 56   ;;  %s772_s21 = smov (!%p87_p2), 48  }
   0xb   : > { %s773_s22 = smov (!%p87_p2), 40   ;;  %s774_s23 = smov (!%p87_p2), 8  }
   0xc   : > { %s775_s24 = smov (!%p87_p2), 16   ;;  %s776_s25 = smov (!%p87_p2), 24  }
   0xd   : > { %s884_s7 = smov (!%p104_p3, %s630_s7), 1 }
   0xe   : > { %s635_s8 = sshll.u32 %s884_s7, 2 }
   0xf   : > { %s107_s11 = scalar_lea.vmem %s881_s0, %s635_s8  ;;  %s111_s28 = scalar_lea.vmem %s882_s1, %s635_s8 }
  0x10   : > { %v113_v1 = vld [vmem:[%s107_s11] sm:$0xf] }
  0x11   : > { %v809_v2 = vcombine.low %v113_v1, %v113_v1 }
  0x13   : > { %117 = vrot.lane.b32.xlu0 %v809_v2, %s763_s12  ;;  %176 = vrot.lane.b32.xlu1 %v809_v2, %s764_s13 }
  0x17   : > { %229 = vrot.lane.b32.xlu1 %v809_v2, %s765_s14 }
  0x1b   : > { %227 = vrot.lane.b32.xlu1 %v809_v2, %s766_s15 }
  0x1f   : > { %339 = vrot.lane.b32.xlu1 %v809_v2, %s767_s16 }
  0x23   : > { %337 = vrot.lane.b32.xlu1 %v809_v2, %s768_s17 }
  0x27   : > { %449 = vrot.lane.b32.xlu1 %v809_v2, %s769_s18 }
  0x2b   : > { %447 = vrot.lane.b32.xlu1 %v809_v2, %s770_s19 }
  0x85   : > { %v118_v3 = vpop.permute.xlu0 %117  ;;  %v177_v10 = vpop.permute.xlu1 %176 }
  0x86   : > { %v124_v4 = vsel %vm119_vm1, %v118_v3, 0  ;;  %v183_v11 = vsel %vm181_vm2, %v177_v10, 0 }
  0x87   : > { %665 = vmatpush3.bf16.xpose.msra.mxu0 %v124_v4  ;;  %671 = vmatpush3.bf16.msra.mxu1 %v183_v11 }
  0x88   : > { %682 = vmatprep.subr.bf16.mxu0 %v761_v0  ;;  %676 = vmatprep.subr.bf16.mxu1 %v761_v0 }
  0x89   : > { %v230_v15 = vpop.permute.xlu1 %229 }
  0x8a   : > { %v235_v18 = vsel %vm119_vm1, %v230_v15, 0 }
  0x8d   : > { %v228_v16 = vpop.permute.xlu1 %227 }
  0x8e   : > { %667 = vmatmul.mubr.msk.bf16.vlgmr.msra.gmra.mrb[0].mxu0 %vm119_vm1, %v113_v1 }
  0x8f   : > { %684 = vmatprep.mubr.msk.bf16.mxu0 %vm762_vm0, %v761_v0 }
  0x91   : > { %v340_v20 = vpop.permute.xlu1 %339 }
  0x92   : > { %v345_v22 = vsel %vm119_vm1, %v340_v20, 0 }
  0x95   : > { %v338_v21 = vpop.permute.xlu1 %337 }
  0x99   : > { %v450_v23 = vpop.permute.xlu1 %449 }
  0x9a   : > { %v455_v24 = vsel %vm119_vm1, %v450_v23, 0 }
  0x9d   : > { %v448_v25 = vpop.permute.xlu1 %447 }
 0x161   : > { %v160_v5 = vpop.f32.mrb[0].mxu0 }
 0x162   : > { %v668_v6 = vpop.f32.mrb[1].mxu0  ;;  %v166_v7 = vsel %vm119_vm1, %v160_v5, -inf }
 0x163   : > { %167 = vmax.xlane.f32.xlu0 %v166_v7  ;;  %v163_v8 = vpop.f32.mrb[2].mxu0 }
 0x164   : > { %v669_v9 = vpop.f32.mrb[3].mxu0 }
 0x179   : > { %287 = vrot.lane.b32.xlu0 %v809_v2, %s771_s20 }
 0x1f0   : > { %v168_v12 = vpop.xlane.xlu0 %167 }
 0x1f1   : > { %v169_v13 = vsub.f32 %v160_v5, %v168_v12 }
 0x1f3   : > { %v170_v14 = vmul.f32 1.442695, %v169_v13 }
 0x1f4   : > { %v288_v26 = vpop.permute.xlu0 %287 }
 0x1f5   : > { %737 = vpow2.f32 %v170_v14  ;;  %v293_v27 = vsel %vm181_vm2, %v288_v26, 0 }
 0x1f6   : > { %683 = vmatpush3.bf16.msra.mxu0 %v293_v27 }
 0x1f7   : > { %694 = vmatprep.subr.bf16.mxu0 %v761_v0 }
 0x1ff   : > { %v828_v17 = vpop.eup %737 }
 0x200   : > { %v175_v19 = vpack.c.bf16 %v828_v17, %v828_v17  ;;  %v172_v6 = vsel %vm119_vm1, %v828_v17, 0.0 }
 0x202   : > { %673 = vmatmul.mubr.msk.bf16.vlgmr.msra.gmra.mrb[0].mxu1 %vm119_vm1, %v175_v19 }
 0x203   : > { %677 = vmatpush3.bf16.xpose.msra.mxu1 %v235_v18  ;;  %678 = vmatprep.mubr.msk.bf16.mxu1 %vm762_vm0, %v761_v0 }
 0x204   : > { %688 = vmatprep.subr.bf16.mxu1 %v761_v0 }
 0x20a   : > { %679 = vmatmul.mubr.msk.bf16.vlgmr.msra.gmra.mrb[4].mxu1 %vm119_vm1, %v228_v16 }
 0x20b   : > { %689 = vmatpush3.bf16.xpose.msra.mxu1 %v345_v22  ;;  %690 = vmatprep.mubr.msk.bf16.mxu1 %vm762_vm0, %v761_v0 }
 0x20c   : > { %700 = vmatprep.subr.bf16.mxu1 %v761_v0 }
 0x212   : > { %691 = vmatmul.mubr.msk.bf16.vlgmr.msra.gmra.mrb[8].mxu1 %vm119_vm1, %v338_v21 }
 0x213   : > { %701 = vmatpush3.bf16.xpose.msra.mxu1 %v455_v24  ;;  %702 = vmatprep.mubr.msk.bf16.mxu1 %vm762_vm0, %v761_v0 }
 0x21a   : > { %703 = vmatmul.mubr.msk.bf16.vlgmr.msra.gmra.mrb[12].mxu1 %vm119_vm1, %v448_v25 }
 0x2d5   : > { %v849_v28 = vpop.f32.mrb[0].mxu1 }
 0x2d6   : > { %v674_v29 = vpop.f32.mrb[1].mxu1 }
 0x2d7   : > { %v222_v30 = vpop.f32.mrb[2].mxu1 }
 0x2d8   : > { %v675_v31 = vpop.f32.mrb[3].mxu1 }
 0x2dd   : > { %v271_v32 = vpop.f32.mrb[4].mxu1 }
 0x2de   : > { %v680_v33 = vpop.f32.mrb[5].mxu1  ;;  %v277_v34 = vsel %vm119_vm1, %v271_v32, -inf }
 0x2df   : > { %278 = vmax.xlane.f32.xlu1 %v277_v34  ;;  %v274_v35 = vpop.f32.mrb[6].mxu1 }
 0x2e0   : > { %v681_v36 = vpop.f32.mrb[7].mxu1 }
 0x2e5   : > { %v381_v37 = vpop.f32.mrb[8].mxu1 }
 0x2e6   : > { %v692_v38 = vpop.f32.mrb[9].mxu1  ;;  %v387_v39 = vsel %vm119_vm1, %v381_v37, -inf }
 0x2e7   : > { %388 = vmax.xlane.f32.xlu0 %v387_v39  ;;  %v384_v40 = vpop.f32.mrb[10].mxu1 }
 0x2e8   : > { %v693_v41 = vpop.f32.mrb[11].mxu1 }
 0x2ed   : > { %v491_v42 = vpop.f32.mrb[12].mxu1 }
 0x2ee   : > { %v704_v43 = vpop.f32.mrb[13].mxu1  ;;  %v497_v44 = vsel %vm119_vm1, %v491_v42, -inf }
 0x2ef   : > { %498 = vmax.xlane.f32.xlu0 %v497_v44  ;;  %v494_v45 = vpop.f32.mrb[14].mxu1 }
 0x2f0   : > { %v705_v46 = vpop.f32.mrb[15].mxu1  ;;  %397 = vrot.lane.b32.xlu1 %v809_v2, %s772_s21 }
 0x305   : > { %507 = vrot.lane.b32.xlu0 %v809_v2, %s773_s22 }
 0x36c   : > { %v279_v47 = vpop.xlane.xlu1 %278 }
 0x36d   : > { %v280_v48 = vsub.f32 %v271_v32, %v279_v47 }
 0x36f   : > { %v281_v49 = vmul.f32 1.442695, %v280_v48 }
 0x370   : > { %v398_v53 = vpop.permute.xlu1 %397 }
 0x371   : > { %739 = vpow2.f32 %v281_v49  ;;  %v403_v55 = vsel %vm181_vm2, %v398_v53, 0 }
 0x374   : > { %v389_v50 = vpop.xlane.xlu0 %388 }
 0x375   : > { %v390_v51 = vsub.f32 %v381_v37, %v389_v50 }
 0x377   : > { %v391_v52 = vmul.f32 1.442695, %v390_v51 }
 0x379   : > { %741 = vpow2.f32 %v391_v52 }
 0x37b   : > { %v740_v54 = vpop.eup %739 }
 0x37c   : > { %v499_v56 = vpop.xlane.xlu0 %498  ;;  %v283_v57 = vsel %vm119_vm1, %v740_v54, 0.0  ;;  %v286_v58 = vpack.c.bf16 %v740_v54, %v740_v54 }
 0x37d   : > { %v500_v59 = vsub.f32 %v491_v42, %v499_v56  ;;  %284 = vadd.xlane.f32.xlu0 %v283_v57 }
 0x37e   : > { %685 = vmatmul.mubr.msk.bf16.vlgmr.msra.gmra.mrb[4].mxu0 %vm119_vm1, %v286_v58 }
 0x37f   : > { %v501_v60 = vmul.f32 1.442695, %v500_v59  ;;  %695 = vmatpush3.bf16.msra.mxu0 %v403_v55  ;;  %696 = vmatprep.mubr.msk.bf16.mxu0 %vm762_vm0, %v761_v0 }
 0x380   : > { %706 = vmatprep.subr.bf16.mxu0 %v761_v0  ;;  %v508_v61 = vpop.permute.xlu0 %507 }
 0x381   : > { %743 = vpow2.f32 %v501_v60  ;;  %v513_v63 = vsel %vm181_vm2, %v508_v61, 0 }
 0x383   : > { %v742_v62 = vpop.eup %741 }
 0x384   : > { %v393_v1 = vsel %vm119_vm1, %v742_v62, 0.0  ;;  %v396_v2 = vpack.c.bf16 %v742_v62, %v742_v62 }
 0x385   : > { %394 = vadd.xlane.f32.xlu1 %v393_v1 }
 0x386   : > { %697 = vmatmul.mubr.msk.bf16.vlgmr.msra.gmra.mrb[8].mxu0 %vm119_vm1, %v396_v2 }
 0x387   : > { %707 = vmatpush3.bf16.msra.mxu0 %v513_v63  ;;  %708 = vmatprep.mubr.msk.bf16.mxu0 %vm762_vm0, %v761_v0 }
 0x38b   : > { %v744_v3 = vpop.eup %743 }
 0x38c   : > { %v503_v4 = vsel %vm119_vm1, %v744_v3, 0.0  ;;  %v506_v5 = vpack.c.bf16 %v744_v3, %v744_v3 }
 0x38d   : > { %504 = vadd.xlane.f32.xlu0 %v503_v4 }
 0x38e   : > { %709 = vmatmul.mubr.msk.bf16.vlgmr.msra.gmra.mrb[12].mxu0 %vm119_vm1, %v506_v5 }
 0x391   : > { %173 = vadd.xlane.f32.xlu0 %v172_v6 }
 0x40a   : > { %v285_v7 = vpop.xlane.xlu0 %284 }
 0x40b   : > { %745 = vrcp.f32 %v285_v7 }
 0x412   : > { %v395_v8 = vpop.xlane.xlu1 %394 }
 0x413   : > { %747 = vrcp.f32 %v395_v8 }
 0x415   : > { %v746_v9 = vpop.eup %745 }
 0x41a   : > { %v505_v13 = vpop.xlane.xlu0 %504 }
 0x41b   : > { %749 = vrcp.f32 %v505_v13 }
 0x41d   : > { %v748_v15 = vpop.eup %747 }
 0x41e   : > { %v174_v27 = vpop.xlane.xlu0 %173 }
 0x41f   : > { %751 = vrcp.f32 %v174_v27 }
 0x425   : > { %v750_v21 = vpop.eup %749 }
 0x429   : > { %v752_v29 = vpop.eup %751 }
 0x42a   : > { %v226_v31 = vmul.f32 %v752_v29, %v849_v28 }
 0x451   : > { %v329_v10 = vpop.f32.mrb[4].mxu0 }
 0x452   : > { %v336_v11 = vmul.f32 %v746_v9, %v329_v10  ;;  %v686_v12 = vpop.f32.mrb[5].mxu0 }
 0x453   : > { %v332_v0 = vpop.f32.mrb[6].mxu0 }
 0x454   : > { %558 = vrot.lane.b32.xlu0 %v336_v11, %s774_s23  ;;  %v687_v14 = vpop.f32.mrb[7].mxu0 }
 0x459   : > { %v439_v16 = vpop.f32.mrb[8].mxu0 }
 0x45a   : > { %v446_v18 = vmul.f32 %v748_v15, %v439_v16  ;;  %v698_v19 = vpop.f32.mrb[9].mxu0 }
 0x45b   : > { %v442_v17 = vpop.f32.mrb[10].mxu0 }
 0x45c   : > { %562 = vrot.lane.b32.xlu1 %v446_v18, %s775_s24  ;;  %v699_v20 = vpop.f32.mrb[11].mxu0 }
 0x461   : > { %v549_v22 = vpop.f32.mrb[12].mxu0 }
 0x462   : > { %v556_v23 = vmul.f32 %v750_v21, %v549_v22  ;;  %v710_v24 = vpop.f32.mrb[13].mxu0 }
 0x463   : > { %v552_v25 = vpop.f32.mrb[14].mxu0 }
 0x464   : > { %566 = vrot.lane.b32.xlu0 %v556_v23, %s776_s25  ;;  %v711_v26 = vpop.f32.mrb[15].mxu0 }
 0x4c6   : > { %v559_v30 = vpop.permute.xlu0 %558 }
 0x4c7   : > { %v569_v33 = vsel %vm119_vm1, %v226_v31, %v559_v30 }
 0x4ce   : > { %v563_v32 = vpop.permute.xlu1 %562 }
 0x4cf   : > { %v571_v34 = vsel %vm570_vm3, %v569_v33, %v563_v32 }
 0x4d6   : > { %v567_v35 = vpop.permute.xlu0 %566 }
 0x4d7   : > { %v573_v36 = vsel %vm572_vm4, %v571_v34, %v567_v35 }
 0x4d8   : > { %v574_v37 = vpack.c.bf16 %v573_v36, %v573_v36 }
 0x4da   : > { %576 = vst.msk [vmem:[%s111_s28] sm:$0xf] %vm575_vm5, %v574_v37 }
 0x4db PF: > { %s11_s6 = sadd.s32 1, %s759_s6  }
 0x4dc   : > { %p8_p4 = scmp.ge.s32.totalorder %s11_s6, 4  }
 0x4de   :  { %10 = sbr.rel (!%p8_p4) target bundleno = 1 (0x1), region = 54 }

// kernel: signal_decomposition_transformer.18
= control target key start
LH: loop header
LB: loop body
LE: loop exit
PB: predicated region body
PF: predicated region fallthrough
CT: control target
= control target key end

     0   :  { %s517_s21 = smov 0   ;;  %s560_s0 = inlined_call_operand.vmem [shape: bf16[16,32], index: 0, kind: input, shape index: {}]   ;;  %s561_s1 = inlined_call_operand.vmem [shape: f32[16,32], index: 1, kind: input, shape index: {}]   ;;  %s562_s2 = inlined_call_operand.vmem [shape: bf16[32,32], index: 2, kind: input, shape index: {}]   ;;  %s563_s3 = inlined_call_operand.vmem [shape: f32[1,32], index: 3, kind: input, shape index: {}]   ;;  %s564_s4 = inlined_call_operand.vmem [shape: f32[1,32], index: 4, kind: input, shape index: {}]   ;;  %s565_s5 = inlined_call_operand.vmem [shape: f32[1,32], index: 5, kind: input, shape index: {}]   ;;  %s566_s6 = inlined_call_operand.vmem [shape: f32[16,32], index: 6, kind: output, shape index: {}]  }
   0x1 LB: > { %s431_s22 = sadd.s32 4294967295, %s478_s21   ;;  %p435_p0 = scmp.ge.s32.totalorder %s478_s21, 1  ;;  %s478_s21 = sphi %s517_s21, %s16_s21  }
   0x2   : > { %p220_p1 = scmp.lt.s32.totalorder %s478_s21, 3 }
   0x4   : > { %p221_p2 = pnand %p435_p0, %p220_p1 }
   0x5   : > { %v468_v0 = vld [vmem:[%s562_s2] sm:$0xff] (!%p221_p2)   ;;  %v480_v1 = vmov (!%p221_p2), 0.0   ;;  %v469_v2 = vld [vmem:[%s562_s2 + $0x8] sm:$0xff] (!%p221_p2)   ;;  %vm481_vm0 = vmmov (!%p221_p2), 0   ;;  %p252_p3 = scmp.lt.s32.totalorder (!%p221_p2), %s431_s22, 1  ;;  %vm289_vm1 = vcmask (!%p221_p2), 261120  }
   0x6   : > { %224 = sbr.rel (%p221_p2) target bundleno = 547 (0x223), region = 44  ;;  %450 = vmatprep.subr.bf16.mxu0 (!%p221_p2), %v480_v1  ;;  %454 = vmatprep.mubr.msk.bf16.mxu0 (!%p221_p2), %vm481_vm0, %v480_v1  ;;  %v439_v4 = vld [vmem:[%s563_s3] ss:$0 sm:$0xff] (!%p221_p2) }
   0x7   : > { %451 = vmatpush3.bf16.msra.mxu0 (!%p221_p2), %v468_v0  ;;  %v443_v22 = vld [vmem:[%s564_s4] ss:$0 sm:$0xff] (!%p221_p2) }
   0x8   : > { %452 = vmatprep.subr.bf16.mxu0 (!%p221_p2), %v480_v1  ;;  %v444_v24 = vld [vmem:[%s565_s5] ss:$0 sm:$0xff] (!%p221_p2) }
   0xb   : > { %453 = vmatpush3.bf16.msra.mxu0 (!%p221_p2), %v469_v2 }
   0xd   : > { %s568_s22 = smov (!%p252_p3, %s431_s22), 1 }
   0xe   : > { %s436_s27 = sshll.u32 %s568_s22, 2  ;;  %s437_s7 = sshll.u32 %s568_s22, 3 }
   0xf   : > { %s255_s30 = scalar_lea.vmem %s560_s0, %s436_s27  ;;  %s259_s10 = scalar_lea.vmem %s561_s1, %s437_s7 }
  0x10   : > { %v265_v3 = vld [vmem:[%s255_s30] sm:$0xf]  ;;  %s263_s19 = scalar_lea.vmem %s566_s6, %s437_s7 }
  0x11   : > { %455 = vmatmul.mubr.msk.bf16.vlgmr.msra.gmra.mrb[0].mxu0 %vm289_vm1, %v265_v3  ;;  %v333_v6 = vld [vmem:[%s259_s10] sm:$0xff] }
  0xe4   : > { %v327_v5 = vpop.f32.mrb[0].mxu0 }
  0xe5   : > { %v328_v7 = vadd.f32 %v439_v4, %v327_v5  ;;  %v456_v8 = vpop.f32.mrb[1].mxu0 }
  0xe6   : > { %v330_v9 = vpop.f32.mrb[2].mxu0 }
  0xe7   : > { %v457_v10 = vpop.f32.mrb[3].mxu0  ;;  %v334_v11 = vadd.f32 %v333_v6, %v328_v7 }
  0xe9   : > { %v335_v12 = vsel %vm289_vm1, %v334_v11, 0.0 }
  0xea   : > { %336 = vadd.xlane.f32.xlu0 %v335_v12 }
 0x177   : > { %v337_v13 = vpop.xlane.xlu0 %336 }
 0x178   : > { %v339_v14 = vmul.f32 0.03125, %v337_v13 }
 0x17a   : > { %v340_v15 = vsub.f32 %v334_v11, %v339_v14 }
 0x17c   : > { %v341_v16 = vmul.f32 %v340_v15, %v340_v15 }
 0x17e   : > { %v342_v17 = vsel %vm289_vm1, %v341_v16, 0.0 }
 0x17f   : > { %343 = vadd.xlane.f32.xlu0 %v342_v17 }
 0x20c   : > { %v344_v18 = vpop.xlane.xlu0 %343 }
 0x20d   : > { %v345_v19 = vmul.f32 0.03125, %v344_v18 }
 0x20f   : > { %v346_v20 = vadd.f32 1e-05, %v345_v19 }
 0x211   : > { %470 = vrsqrt.f32 %v346_v20 }
 0x21b   : > { %v471_v21 = vpop.eup %470 }
 0x21c   : > { %v348_v23 = vmul.f32 %v471_v21, %v340_v15 }
 0x21e   : > { %v356_v25 = vmul.f32 %v443_v22, %v348_v23 }
 0x220   : > { %v364_v26 = vadd.f32 %v444_v24, %v356_v25 }
 0x222   : > { %365 = vst.msk [vmem:[%s263_s19] sm:$0xff] %vm289_vm1, %v364_v26 }
 0x223 PF: > { %s16_s21 = sadd.s32 1, %s478_s21  }
 0x224   : > { %p13_p4 = scmp.ge.s32.totalorder %s16_s21, 4  }
 0x226   :  { %15 = sbr.rel (!%p13_p4) target bundleno = 1 (0x1), region = 77 }

// kernel: signal_decomposition_transformer.24
= control target key start
LH: loop header
LB: loop body
LE: loop exit
PB: predicated region body
PF: predicated region fallthrough
CT: control target
= control target key end

     0   :  { %s357_s12 = smov 0   ;;  %s383_s0 = inlined_call_operand.vmem [shape: f32[16,32], index: 0, kind: input, shape index: {}]   ;;  %s384_s1 = inlined_call_operand.vmem [shape: bf16[32,128], index: 1, kind: input, shape index: {}]   ;;  %s385_s2 = inlined_call_operand.vmem [shape: f32[1,128], index: 2, kind: input, shape index: {}]   ;;  %s386_s3 = inlined_call_operand.vmem [shape: f32[16,128], index: 3, kind: output, shape index: {}]  }
   0x1 LB: > { %s291_s13 = sadd.s32 4294967295, %s333_s12   ;;  %p295_p0 = scmp.ge.s32.totalorder %s333_s12, 1  ;;  %s333_s12 = sphi %s357_s12, %s13_s12  }
   0x2   : > { %p136_p1 = scmp.lt.s32.totalorder %s333_s12, 3 }
   0x4   : > { %p137_p2 = pnand %p295_p0, %p136_p1 }
   0x5   : > { %v325_v0 = vld [vmem:[%s384_s1] sm:$0xff] (!%p137_p2)   ;;  %v335_v1 = vmov (!%p137_p2), 0.0   ;;  %v326_v2 = vld [vmem:[%s384_s1 + $0x8] sm:$0xff] (!%p137_p2)   ;;  %vm336_vm0 = vmmov (!%p137_p2), 0   ;;  %p158_p3 = scmp.lt.s32.totalorder (!%p137_p2), %s291_s13, 1  ;;  %vm192_vm1 = vcmask (!%p137_p2), 261120  }
   0x6   : > { %140 = sbr.rel (%p137_p2) target bundleno = 236 (0xec), region = 32  ;;  %307 = vmatprep.subr.bf16.mxu0 (!%p137_p2), %v335_v1  ;;  %311 = vmatprep.mubr.msk.bf16.mxu0 (!%p137_p2), %vm336_vm0, %v335_v1  ;;  %v298_v5 = vld [vmem:[%s385_s2] ss:$0 sm:$0xff] (!%p137_p2) }
   0x7   : > { %308 = vmatpush3.bf16.msra.mxu0 (!%p137_p2), %v325_v0 }
   0x8   : > { %309 = vmatprep.subr.bf16.mxu0 (!%p137_p2), %v335_v1 }
   0xb   : > { %310 = vmatpush3.bf16.msra.mxu0 (!%p137_p2), %v326_v2 }
   0xd   : > { %s388_s13 = smov (!%p158_p3, %s291_s13), 1 }
   0xe   : > { %s296_s18 = sshll.u32 %s388_s13, 3 }
   0xf   : > { %s161_s21 = scalar_lea.vmem %s383_s0, %s296_s18  ;;  %s165_s26 = scalar_lea.vmem %s386_s3, %s296_s18 }
  0x10   : > { %v167_v3 = vld [vmem:[%s161_s21] sm:$0xff] }
  0x11   : > { %v168_v4 = vpack.c.bf16 %v167_v3, %v167_v3 }
  0x13   : > { %312 = vmatmul.mubr.msk.bf16.vlgmr.msra.gmra.mrb[0].mxu0 %vm192_vm1, %v168_v4 }
  0xe6   : > { %v230_v6 = vpop.f32.mrb[0].mxu0 }
  0xe7   : > { %v231_v7 = vadd.f32 %v298_v5, %v230_v6  ;;  %v313_v8 = vpop.f32.mrb[1].mxu0 }
  0xe8   : > { %v233_v9 = vpop.f32.mrb[2].mxu0 }
  0xe9   : > { %v236_v10 = vmax.f32 %v231_v7, 0.0  ;;  %v314_v11 = vpop.f32.mrb[3].mxu0 }
  0xeb   : > { %237 = vst [vmem:[%s165_s26] sm:$0xff] %v236_v10 }
  0xec PF: > { %s13_s12 = sadd.s32 1, %s333_s12  }
  0xed   : > { %p10_p4 = scmp.ge.s32.totalorder %s13_s12, 4  }
  0xef   :  { %12 = sbr.rel (!%p10_p4) target bundleno = 1 (0x1), region = 62 }

// kernel: signal_decomposition_transformer.19
= control target key start
LH: loop header
LB: loop body
LE: loop exit
PB: predicated region body
PF: predicated region fallthrough
CT: control target
= control target key end

     0   :  { %s661_s24 = smov 0   ;;  %s719_s0 = inlined_call_operand.vmem [shape: f32[16,32], index: 0, kind: input, shape index: {}]   ;;  %s720_s1 = inlined_call_operand.vmem [shape: bf16[32,64], index: 1, kind: input, shape index: {}]   ;;  %s721_s2 = inlined_call_operand.vmem [shape: f32[1,64], index: 2, kind: input, shape index: {}]   ;;  %s722_s3 = inlined_call_operand.vmem [shape: bf16[64,32], index: 3, kind: input, shape index: {}]   ;;  %s723_s4 = inlined_call_operand.vmem [shape: f32[1,32], index: 4, kind: input, shape index: {}]   ;;  %s724_s5 = inlined_call_operand.vmem [shape: f32[1,32], index: 5, kind: input, shape index: {}]   ;;  %s725_s6 = inlined_call_operand.vmem [shape: f32[1,32], index: 6, kind: input, shape index: {}]   ;;  %s726_s7 = inlined_call_operand.vmem [shape: f32[16,32], index: 7, kind: output, shape index: {}]  }
   0x1 LB: > { %s540_s25 = sadd.s32 4294967295, %s617_s24   ;;  %p544_p0 = scmp.ge.s32.totalorder %s617_s24, 1  ;;  %s617_s24 = sphi %s661_s24, %s17_s24  }
   0x2   : > { %p236_p1 = scmp.lt.s32.totalorder %s617_s24, 3 }
   0x4   : > { %p237_p2 = pnand %p544_p0, %p236_p1 }
   0x5   : > { %v599_v0 = vld [vmem:[%s720_s1] sm:$0xff] (!%p237_p2)   ;;  %v619_v1 = vmov (!%p237_p2), 0.0   ;;  %v600_v2 = vld [vmem:[%s720_s1 + $0x8] sm:$0xff] (!%p237_p2)   ;;  %vm620_vm0 = vmmov (!%p237_p2), 0   ;;  %p266_p3 = scmp.lt.s32.totalorder (!%p237_p2), %s540_s25, 1  ;;  %vm300_vm1 = vcmask (!%p237_p2), 261120  }
   0x6   : > { %240 = sbr.rel (%p237_p2) target bundleno = 813 (0x32d), region = 48  ;;  %569 = vmatprep.subr.bf16.mxu0 (!%p237_p2), %v619_v1  ;;  %577 = vmatprep.subr.bf16.mxu1 (!%p237_p2), %v619_v1  ;;  %v601_v5 = vld [vmem:[%s722_s3] sm:$0xff] (!%p237_p2)   ;;  %v602_v6 = vld [vmem:[%s722_s3 + $0x8] sm:$0xff] (!%p237_p2)   ;;  %v603_v7 = vld [vmem:[%s722_s3 + $0x10] sm:$0xff] (!%p237_p2)   ;;  %vm411_vm3 = vcmask (!%p237_p2), 523264  }
   0x7   : > { %570 = vmatpush3.bf16.msra.mxu0 (!%p237_p2), %v599_v0  ;;  %573 = vmatprep.mubr.msk.bf16.mxu0 (!%p237_p2), %vm620_vm0, %v619_v1  ;;  %v604_v8 = vld [vmem:[%s722_s3 + $0x18] sm:$0xff] (!%p237_p2)   ;;  %v547_v9 = vld [vmem:[%s721_s2] ss:$0 sm:$0xff] (!%p237_p2) }
   0x8   : > { %571 = vmatprep.subr.bf16.mxu0 (!%p237_p2), %v619_v1  ;;  %585 = vmatprep.mubr.msk.bf16.mxu1 (!%p237_p2), %vm620_vm0, %v619_v1  ;;  %v551_v41 = vld [vmem:[%s723_s4] ss:$0 sm:$0xff] (!%p237_p2) }
   0x9   : > { %578 = vmatpush3.bf16.msra.mxu1 (!%p237_p2), %v601_v5  ;;  %v557_v58 = vld [vmem:[%s724_s5] ss:$0 sm:$0xff] (!%p237_p2) }
   0xa   : > { %579 = vmatprep.subr.bf16.mxu1 (!%p237_p2), %v619_v1  ;;  %v558_v60 = vld [vmem:[%s725_s6] ss:$0 sm:$0xff] (!%p237_p2) }
   0xb   : > { %572 = vmatpush3.bf16.msra.mxu0 (!%p237_p2), %v600_v2 }
   0xd   : > { %s728_s25 = smov (!%p266_p3, %s540_s25), 1  ;;  %580 = vmatpush3.bf16.msra.mxu1 %v602_v6 }
   0xe   : > { %s545_s30 = sshll.u32 %s728_s25, 3  ;;  %581 = vmatprep.subr.bf16.mxu1 %v619_v1 }
   0xf   : > { %s269_s10 = scalar_lea.vmem %s719_s0, %s545_s30  ;;  %s273_s9 = scalar_lea.vmem %s726_s7, %s545_s30 }
  0x10   : > { %v275_v3 = vld [vmem:[%s269_s10] sm:$0xff] }
  0x11   : > { %v276_v4 = vpack.c.bf16 %v275_v3, %v275_v3  ;;  %582 = vmatpush3.bf16.msra.mxu1 %v603_v7 }
  0x12   : > { %583 = vmatprep.subr.bf16.mxu1 %v619_v1 }
  0x13   : > { %574 = vmatmul.mubr.msk.bf16.vlgmr.msra.gmra.mrb[0].mxu0 %vm300_vm1, %v276_v4 }
  0x15   : > { %584 = vmatpush3.bf16.msra.mxu1 %v604_v8 }
  0xe6   : > { %v338_v10 = vpop.f32.mrb[0].mxu0 }
  0xe7   : > { %v339_v11 = vadd.f32 %v547_v9, %v338_v10  ;;  %v575_v12 = vpop.f32.mrb[1].mxu0 }
  0xe8   : > { %v341_v13 = vpop.f32.mrb[2].mxu0 }
  0xe9   : > { %v345_v14 = vmul.f32 0.70710677, %v339_v11  ;;  %v576_v15 = vpop.f32.mrb[3].mxu0  ;;  %v344_v37 = vmul.f32 0.5, %v339_v11 }
  0xeb   : > { %v346_v16 = vand.u32 2147483647, %v345_v14  ;;  %vm366_vm2 = vcmp.ge.f32.partialorder %v345_v14, 0.0 }
  0xed   : > { %v347_v17 = vmul.f32 0.3275911, %v346_v16  ;;  %v360_v19 = vsub.f32 0.0, %v346_v16 }
  0xef   : > { %v348_v18 = vadd.f32 1.0, %v347_v17  ;;  %v361_v21 = vmul.f32 %v360_v19, %v346_v16 }
  0xf1   : > { %605 = vrcp.f32 %v348_v18  ;;  %v362_v24 = vmul.f32 1.442695, %v361_v21 }
  0xf3   : > { %607 = vpow2.f32 %v362_v24 }
  0xfb   : > { %v606_v20 = vpop.eup %605 }
  0xfc   : > { %v351_v22 = vmul.f32 1.0614054, %v606_v20 }
  0xfd   : > { %v608_v32 = vpop.eup %607 }
  0xfe   : > { %v352_v23 = vadd.f32 -1.4531521, %v351_v22 }
 0x100   : > { %v353_v25 = vmul.f32 %v606_v20, %v352_v23 }
 0x102   : > { %v354_v26 = vadd.f32 1.4214138, %v353_v25 }
 0x104   : > { %v355_v27 = vmul.f32 %v606_v20, %v354_v26 }
 0x106   : > { %v356_v28 = vadd.f32 -0.28449672, %v355_v27 }
 0x108   : > { %v357_v29 = vmul.f32 %v606_v20, %v356_v28 }
 0x10a   : > { %v358_v30 = vadd.f32 0.2548296, %v357_v29 }
 0x10c   : > { %v359_v31 = vmul.f32 %v606_v20, %v358_v30 }
 0x10e   : > { %v364_v33 = vmul.f32 %v608_v32, %v359_v31 }
 0x110   : > { %v365_v34 = vsub.f32 1.0, %v364_v33 }
 0x112   : > { %v367_v35 = vsub.f32 0.0, %v365_v34 }
 0x114   : > { %v368_v36 = vsel %vm366_vm2, %v365_v34, %v367_v35 }
 0x115   : > { %v369_v38 = vadd.f32 1.0, %v368_v36 }
 0x117   : > { %v370_v39 = vmul.f32 %v369_v38, %v344_v37 }
 0x119   : > { %v371_v40 = vpack.c.bf16 %v370_v39, %v370_v39 }
 0x11b   : > { %586 = vmatmul.mubr.msk.bf16.vlgmr.msra.gmra.mrb[0].mxu1 %vm411_vm3, %v371_v40 }
 0x1ee   : > { %v449_v42 = vpop.f32.mrb[0].mxu1 }
 0x1ef   : > { %v450_v43 = vadd.f32 %v551_v41, %v449_v42  ;;  %v587_v44 = vpop.f32.mrb[1].mxu1 }
 0x1f0   : > { %v452_v45 = vpop.f32.mrb[2].mxu1 }
 0x1f1   : > { %v588_v46 = vpop.f32.mrb[3].mxu1  ;;  %v455_v47 = vadd.f32 %v450_v43, %v275_v3 }
 0x1f3   : > { %v456_v48 = vsel %vm300_vm1, %v455_v47, 0.0 }
 0x1f4   : > { %457 = vadd.xlane.f32.xlu0 %v456_v48 }
 0x281   : > { %v458_v49 = vpop.xlane.xlu0 %457 }
 0x282   : > { %v460_v50 = vmul.f32 0.03125, %v458_v49 }
 0x284   : > { %v461_v51 = vsub.f32 %v455_v47, %v460_v50 }
 0x286   : > { %v462_v52 = vmul.f32 %v461_v51, %v461_v51 }
 0x288   : > { %v463_v53 = vsel %vm300_vm1, %v462_v52, 0.0 }
 0x289   : > { %464 = vadd.xlane.f32.xlu0 %v463_v53 }
 0x316   : > { %v465_v54 = vpop.xlane.xlu0 %464 }
 0x317   : > { %v466_v55 = vmul.f32 0.03125, %v465_v54 }
 0x319   : > { %v467_v56 = vadd.f32 1e-05, %v466_v55 }
 0x31b   : > { %609 = vrsqrt.f32 %v467_v56 }
 0x325   : > { %v610_v57 = vpop.eup %609 }
 0x326   : > { %v469_v59 = vmul.f32 %v610_v57, %v461_v51 }
 0x328   : > { %v477_v61 = vmul.f32 %v557_v58, %v469_v59 }
 0x32a   : > { %v485_v62 = vadd.f32 %v558_v60, %v477_v61 }
 0x32c   : > { %486 = vst.msk [vmem:[%s273_s9] sm:$0xff] %vm300_vm1, %v485_v62 }
 0x32d PF: > { %s17_s24 = sadd.s32 1, %s617_s24  }
 0x32e   : > { %p14_p4 = scmp.ge.s32.totalorder %s17_s24, 4  }
 0x330   :  { %16 = sbr.rel (!%p14_p4) target bundleno = 1 (0x1), region = 78 }

// kernel: signal_decomposition_transformer.25
= control target key start
LH: loop header
LB: loop body
LE: loop exit
PB: predicated region body
PF: predicated region fallthrough
CT: control target
= control target key end

     0   :  { %s615_s12 = smov 0   ;;  %s747_s0 = inlined_call_operand.vmem [shape: f32[2,36,32], index: 0, kind: input, shape index: {}]   ;;  %s748_s1 = inlined_call_operand.vmem [shape: bf16[160,32], index: 1, kind: input, shape index: {}]   ;;  %s749_s2 = inlined_call_operand.vmem [shape: f32[1,32], index: 2, kind: input, shape index: {}]   ;;  %s750_s3 = inlined_call_operand.vmem [shape: f32[2,32,32], index: 3, kind: output, shape index: {}]  }
   0x1 LB: > { %s486_s13 = sadd.s32 4294967295, %s589_s12   ;;  %p490_p0 = scmp.ge.s32.totalorder %s589_s12, 1  ;;  %s589_s12 = sphi %s615_s12, %s13_s12  }
   0x2   : > { %p137_p1 = scmp.lt.s32.totalorder %s589_s12, 3 }
   0x4   : > { %p138_p2 = pnand %p490_p0, %p137_p1 }
   0x5   : > { %p161_p3 = scmp.lt.s32.totalorder (!%p138_p2), %s486_s13, 1  ;;  %v591_v0 = vmov (!%p138_p2), 0   ;;  %v573_v1 = vld [vmem:[%s748_s1] sm:$0xff] (!%p138_p2)   ;;  %v574_v2 = vld [vmem:[%s748_s1 + $0x8] sm:$0xff] (!%p138_p2)   ;;  %vm204_vm0 = vcmask (!%p138_p2), 1045504   ;;  %vm182_vm1 = vcmask (!%p138_p2), 1046528  }
   0x6   : > { %141 = sbr.rel (%p138_p2) target bundleno = 371 (0x173), region = 32  ;;  %374 = vmatprep.subr.bf16.mxu0 (!%p138_p2), %v591_v0  ;;  %510 = vmatprep.subr.bf16.mxu1 (!%p138_p2), %v591_v0  ;;  %vm226_vm2 = vcmask (!%p138_p2), 1044480   ;;  %v575_v11 = vld [vmem:[%s748_s1 + $0x10] sm:$0xff] (!%p138_p2)   ;;  %v576_v29 = vld [vmem:[%s748_s1 + $0x18] sm:$0xff] (!%p138_p2)   ;;  %s592_s26 = smov (!%p138_p2), 64   ;;  %vm248_vm3 = vcmask (!%p138_p2), 1043456  }
   0x7   : > { %375 = vmatpush1.bf16.msra.mxu0 (!%p138_p2), %v573_v1  ;;  %520 = vmatpush1.bf16.msra.mxu1 (!%p138_p2), %v573_v1  ;;  %s593_s27 = smov (!%p138_p2), 32   ;;  %v577_v44 = vld [vmem:[%s748_s1 + $0x20] sm:$0xff] (!%p138_p2)   ;;  %v578_v54 = vld [vmem:[%s748_s1 + $0x28] sm:$0xff] (!%p138_p2)   ;;  %s594_s5 = smov (!%p138_p2), 96   ;;  %vm262_vm4 = vcmask (!%p138_p2), 261120   ;;  %v579_v56 = vld [vmem:[%s748_s1 + $0x30] sm:$0xff] (!%p138_p2)  }
   0x8   : > { %376 = vmatprep.subr.bf16.mxu0 (!%p138_p2), %v591_v0  ;;  %511 = vmatprep.subr.bf16.mxu1 (!%p138_p2), %v591_v0  ;;  %v580_v57 = vld [vmem:[%s748_s1 + $0x38] sm:$0xff] (!%p138_p2)   ;;  %v581_v58 = vld [vmem:[%s748_s1 + $0x40] sm:$0xff] (!%p138_p2)   ;;  %v582_v59 = vld [vmem:[%s748_s1 + $0x48] sm:$0xff] (!%p138_p2)   ;;  %vm267_vm5 = vcmask (!%p138_p2), 523264   ;;  %vm272_vm6 = vcmask (!%p138_p2), 785408  }
   0xb   : > { %377 = vmatpush1.bf16.msra.mxu0 (!%p138_p2), %v574_v2  ;;  %521 = vmatpush1.bf16.msra.mxu1 (!%p138_p2), %v574_v2 }
   0xc   : > { %378 = vmatprep.subr.bf16.mxu0 (!%p138_p2), %v591_v0  ;;  %512 = vmatprep.subr.bf16.mxu1 (!%p138_p2), %v591_v0 }
   0xd   : > { %s752_s13 = smov (!%p161_p3, %s486_s13), 1 }
   0xe   : > { %s530_s16 = smul.u32 40, %s752_s13  ;;  %s509_s18 = sshll.u32 %s752_s13, 5 }
   0xf   : > { %379 = vmatpush1.bf16.msra.mxu0 %v575_v11  ;;  %522 = vmatpush1.bf16.msra.mxu1 %v575_v11 }
  0x10   : > { %s165_s21 = scalar_lea.vmem %s747_s0, %s530_s16  ;;  %380 = vmatprep.subr.bf16.mxu0 %v591_v0  ;;  %513 = vmatprep.subr.bf16.mxu1 %v591_v0 }
  0x11   : > { %v639_v3 = vld [vmem:[%s165_s21] sm:$0xff]  ;;  %v641_v4 = vld [vmem:[%s165_s21 + $0x8] sm:$0xff]  ;;  %v643_v5 = vld [vmem:[%s165_s21 + $0x10] sm:$0xff] }
  0x12   : > { %v205_v6 = vrot.slane %v639_v3, 2  ;;  %v206_v7 = vrot.slane %v641_v4, 2  ;;  %v208_v8 = vrot.slane %v643_v5, 2  ;;  %v183_v9 = vrot.slane %v639_v3, 1  ;;  %v649_v10 = vld [vmem:[%s165_s21 + $0x18] sm:$0xff] }
  0x13   : > { %v184_v12 = vrot.slane %v641_v4, 1  ;;  %v186_v13 = vrot.slane %v643_v5, 1  ;;  %v176_v14 = vld [vmem:[%s165_s21 + $0x20] sm:$0xf]  ;;  %v210_v15 = vrot.slane %v649_v10, 2  ;;  %v188_v16 = vrot.slane %v649_v10, 1  ;;  %381 = vmatpush1.bf16.msra.mxu0 %v576_v29  ;;  %523 = vmatpush1.bf16.msra.mxu1 %v576_v29  ;;  %s170_s21 = scalar_lea.vmem %s750_s3, %s509_s18 }
  0x14   : > { %v207_v17 = vsel %vm204_vm0, %v205_v6, %v206_v7  ;;  %v209_v18 = vsel %vm204_vm0, %v206_v7, %v208_v8  ;;  %v212_v19 = vrot.slane %v176_v14, 2  ;;  %v190_v20 = vrot.slane %v176_v14, 1  ;;  %382 = vmatprep.subr.bf16.mxu0 %v591_v0  ;;  %514 = vmatprep.subr.bf16.mxu1 %v591_v0 }
  0x15   : > { %v553_v21 = vpack.i.bf16 %v209_v18, %v207_v17  ;;  %v185_v22 = vsel %vm182_vm1, %v183_v9, %v184_v12  ;;  %v187_v23 = vsel %vm182_vm1, %v184_v12, %v186_v13  ;;  %v211_v24 = vsel %vm204_vm0, %v208_v8, %v210_v15 }
  0x16   : > { %v543_v25 = vpack.i.bf16 %v187_v23, %v185_v22  ;;  %v213_v26 = vsel %vm204_vm0, %v210_v15, %v212_v19  ;;  %v189_v27 = vsel %vm182_vm1, %v186_v13, %v188_v16  ;;  %v191_v28 = vsel %vm182_vm1, %v188_v16, %v190_v20 }
  0x17   : > { %554 = vrot.lane.b32.xlu1 %v553_v21, %s592_s26  ;;  %v558_v30 = vpack.i.bf16 %v213_v26, %v211_v24  ;;  %v548_v31 = vpack.i.bf16 %v191_v28, %v189_v27  ;;  %v230_v32 = vrot.slane %v643_v5, 3  ;;  %v232_v33 = vrot.slane %v649_v10, 3  ;;  %383 = vmatpush1.bf16.msra.mxu0 %v577_v44  ;;  %v494_v28 = vld [vmem:[%s749_s2] ss:$0 sm:$0xff] }
  0x18   : > { %544 = vrot.lane.b32.xlu0 %v543_v25, %s593_s27  ;;  %v234_v34 = vrot.slane %v176_v14, 3  ;;  %v227_v35 = vrot.slane %v639_v3, 3  ;;  %v228_v36 = vrot.slane %v641_v4, 3  ;;  %v249_v38 = vrot.slane %v639_v3, 4  ;;  %524 = vmatpush1.bf16.msra.mxu1 %v577_v44 }
  0x19   : > { %v233_v37 = vsel %vm226_vm2, %v230_v32, %v232_v33  ;;  %v250_v39 = vrot.slane %v641_v4, 4  ;;  %v252_v40 = vrot.slane %v643_v5, 4  ;;  %v254_v45 = vrot.slane %v649_v10, 4  ;;  %384 = vmatprep.subr.bf16.mxu0 %v591_v0  ;;  %515 = vmatprep.subr.bf16.mxu1 %v591_v0 }
  0x1a   : > { %v235_v41 = vsel %vm226_vm2, %v232_v33, %v234_v34  ;;  %v229_v42 = vsel %vm226_vm2, %v227_v35, %v228_v36  ;;  %v231_v43 = vsel %vm226_vm2, %v228_v36, %v230_v32  ;;  %v256_v48 = vrot.slane %v176_v14, 4 }
  0x1b   : > { %559 = vrot.lane.b32.xlu1 %v558_v30, %s592_s26  ;;  %v568_v46 = vpack.i.bf16 %v235_v41, %v233_v37  ;;  %v251_v47 = vsel %vm248_vm3, %v249_v38, %v250_v39  ;;  %v563_v49 = vpack.i.bf16 %v231_v43, %v229_v42  ;;  %v253_v50 = vsel %vm248_vm3, %v250_v39, %v252_v40 }
  0x1c   : > { %549 = vrot.lane.b32.xlu0 %v548_v31, %s593_s27  ;;  %v255_v51 = vsel %vm248_vm3, %v252_v40, %v254_v45  ;;  %v278_v52 = vpack.c.bf16 %v253_v50, %v251_v47  ;;  %v257_v53 = vsel %vm248_vm3, %v254_v45, %v256_v48  ;;  %385 = vmatpush1.bf16.msra.mxu0 %v578_v54 }
  0x1d   : > { %v280_v55 = vpack.c.bf16 %v257_v53, %v255_v51  ;;  %525 = vmatpush1.bf16.msra.mxu1 %v578_v54  ;;  %386 = vmatprep.subr.bf16.mxu0 %v591_v0 }
  0x1e   : > { %505 = vmatprep.mubr.msk.bf16.mxu0 %vm262_vm4, %v278_v52  ;;  %516 = vmatprep.subr.bf16.mxu1 %v591_v0 }
  0x1f   : > { %569 = vrot.lane.b32.xlu1 %v568_v46, %s594_s5  ;;  %506 = vmatprep.mubr.msk.bf16.mxu1 %vm262_vm4, %v280_v55 }
  0x20   : > { %564 = vrot.lane.b32.xlu0 %v563_v49, %s594_s5  ;;  %387 = vmatpush1.bf16.msra.mxu0 %v579_v56 }
  0x21   : > { %526 = vmatpush1.bf16.msra.mxu1 %v579_v56  ;;  %388 = vmatprep.subr.bf16.mxu0 %v591_v0 }
  0x22   : > { %517 = vmatprep.subr.bf16.mxu1 %v591_v0 }
  0x24   : > { %389 = vmatpush1.bf16.msra.mxu0 %v580_v57 }
  0x25   : > { %527 = vmatpush1.bf16.msra.mxu1 %v580_v57  ;;  %390 = vmatprep.subr.bf16.mxu0 %v591_v0 }
  0x26   : > { %518 = vmatprep.subr.bf16.mxu1 %v591_v0 }
  0x28   : > { %391 = vmatpush1.bf16.msra.mxu0 %v581_v58 }
  0x29   : > { %528 = vmatpush1.bf16.msra.mxu1 %v581_v58  ;;  %392 = vmatprep.subr.bf16.mxu0 %v591_v0 }
  0x2a   : > { %519 = vmatprep.subr.bf16.mxu1 %v591_v0 }
  0x2c   : > { %393 = vmatpush1.bf16.msra.mxu0 %v582_v59 }
  0x2d   : > { %529 = vmatpush1.bf16.msra.mxu1 %v582_v59 }
  0x89   : > { %v555_v60 = vpop.permute.xlu1 %554 }
  0x8a   : > { %v545_v61 = vpop.permute.xlu0 %544  ;;  %v557_v11 = vunpack.i.h.bf16 %v555_v60  ;;  %v556_v12 = vunpack.i.l.bf16 %v555_v60 }
  0x8b   : > { %v547_v62 = vunpack.i.h.bf16 %v545_v61  ;;  %v546_v63 = vunpack.i.l.bf16 %v545_v61 }
  0x8d   : > { %v560_v1 = vpop.permute.xlu1 %559  ;;  %v264_v13 = vsel %vm262_vm4, %v641_v4, %v547_v62  ;;  %v263_v0 = vsel %vm262_vm4, %v639_v3, %v546_v63 }
  0x8e   : > { %v550_v2 = vpop.permute.xlu0 %549  ;;  %v562_v6 = vunpack.i.h.bf16 %v560_v1  ;;  %v561_v7 = vunpack.i.l.bf16 %v560_v1  ;;  %v268_v24 = vsel %vm267_vm5, %v263_v0, %v556_v12  ;;  %v269_v4 = vsel %vm267_vm5, %v264_v13, %v557_v11 }
  0x8f   : > { %v552_v8 = vunpack.i.h.bf16 %v550_v2  ;;  %v551_v9 = vunpack.i.l.bf16 %v550_v2 }
  0x91   : > { %v266_v14 = vsel %vm262_vm4, %v649_v10, %v552_v8  ;;  %v265_v15 = vsel %vm262_vm4, %v643_v5, %v551_v9  ;;  %v570_v16 = vpop.permute.xlu1 %569 }
  0x92   : > { %v572_v17 = vunpack.i.h.bf16 %v570_v16  ;;  %v571_v18 = vunpack.i.l.bf16 %v570_v16  ;;  %v565_v19 = vpop.permute.xlu0 %564  ;;  %v270_v22 = vsel %vm267_vm5, %v265_v15, %v561_v7  ;;  %v271_v23 = vsel %vm267_vm5, %v266_v14, %v562_v6 }
  0x93   : > { %v567_v20 = vunpack.i.h.bf16 %v565_v19  ;;  %v566_v21 = vunpack.i.l.bf16 %v565_v19 }
  0x94   : > { %v275_v25 = vsel %vm272_vm6, %v270_v22, %v571_v18  ;;  %v276_v3 = vsel %vm272_vm6, %v271_v23, %v572_v17 }
  0x95   : > { %v273_v10 = vsel %vm272_vm6, %v268_v24, %v566_v21  ;;  %v274_v26 = vsel %vm272_vm6, %v269_v4, %v567_v20  ;;  %v279_v5 = vpack.c.bf16 %v276_v3, %v275_v25 }
  0x96   : > { %v277_v27 = vpack.c.bf16 %v274_v26, %v273_v10 }
  0x97   : > { %415 = vmatmul.mubr.bf16.vlgmr.msra.gmra.mrb[0].mxu1 %v279_v5 }
  0x98   : > { %407 = vmatmul.mubr.bf16.vlgmr.msra.gmra.mrb[0].mxu0 %v277_v27 }
 0x16a   : > { %v416_v29 = vpop.f32.mrb[0].mxu1 }
 0x16b   : > { %v408_v30 = vpop.f32.mrb[0].mxu0  ;;  %v417_v31 = vadd.f32 %v494_v28, %v416_v29  ;;  %v418_v32 = vpop.f32.mrb[1].mxu1 }
 0x16c   : > { %v409_v33 = vadd.f32 %v494_v28, %v408_v30  ;;  %v410_v34 = vpop.f32.mrb[1].mxu0  ;;  %v419_v35 = vpop.f32.mrb[2].mxu1 }
 0x16d   : > { %v425_v36 = vmax.f32 %v417_v31, 0.0  ;;  %v411_v37 = vpop.f32.mrb[2].mxu0  ;;  %v420_v38 = vadd.f32 %v494_v28, %v419_v35  ;;  %v421_v39 = vpop.f32.mrb[3].mxu1 }
 0x16e   : > { %v423_v40 = vmax.f32 %v409_v33, 0.0  ;;  %v412_v41 = vadd.f32 %v494_v28, %v411_v37  ;;  %v413_v42 = vpop.f32.mrb[3].mxu0 }
 0x16f   : > { %429 = vst.msk [vmem:[%s170_s21 + $0x10] sm:$0xff] %vm262_vm4, %v425_v36  ;;  %v426_v43 = vmax.f32 %v420_v38, 0.0 }
 0x170   : > { %427 = vst.msk [vmem:[%s170_s21] sm:$0xff] %vm262_vm4, %v423_v40  ;;  %v424_v44 = vmax.f32 %v412_v41, 0.0 }
 0x171   : > { %430 = vst.msk [vmem:[%s170_s21 + $0x18] sm:$0xff] %vm262_vm4, %v426_v43 }
 0x172   : > { %428 = vst.msk [vmem:[%s170_s21 + $0x8] sm:$0xff] %vm262_vm4, %v424_v44 }
 0x173 PF: > { %s13_s12 = sadd.s32 1, %s589_s12  }
 0x174   : > { %p10_p4 = scmp.ge.s32.totalorder %s13_s12, 4  }
 0x176   :  { %12 = sbr.rel (!%p10_p4) target bundleno = 1 (0x1), region = 62 }

// kernel: signal_decomposition_transformer.26
= control target key start
LH: loop header
LB: loop body
LE: loop exit
PB: predicated region body
PF: predicated region fallthrough
CT: control target
= control target key end

     0   :  { %s524_s12 = smov 0   ;;  %s587_s0 = inlined_call_operand.vmem [shape: f32[2,34,32], index: 0, kind: input, shape index: {}]   ;;  %s588_s1 = inlined_call_operand.vmem [shape: bf16[96,16], index: 1, kind: input, shape index: {}]   ;;  %s589_s2 = inlined_call_operand.vmem [shape: f32[1,16], index: 2, kind: input, shape index: {}]   ;;  %s590_s3 = inlined_call_operand.vmem [shape: f32[2,32,16], index: 3, kind: output, shape index: {}]  }
   0x1 LB: > { %s413_s13 = sadd.s32 4294967295, %s500_s12   ;;  %p417_p0 = scmp.ge.s32.totalorder %s500_s12, 1  ;;  %s500_s12 = sphi %s524_s12, %s13_s12  }
   0x2   : > { %p137_p1 = scmp.lt.s32.totalorder %s500_s12, 3 }
   0x4   : > { %p138_p2 = pnand %p417_p0, %p137_p1 }
   0x5   : > { %p161_p3 = scmp.lt.s32.totalorder (!%p138_p2), %s413_s13, 1  ;;  %v488_v0 = vld [vmem:[%s588_s1] sm:$0xff] (!%p138_p2)   ;;  %v489_v1 = vld [vmem:[%s588_s1 + $0x8] sm:$0xff] (!%p138_p2)   ;;  %v490_v2 = vld [vmem:[%s588_s1 + $0x10] sm:$0xff] (!%p138_p2)   ;;  %vm182_vm0 = vcmask (!%p138_p2), 1046528   ;;  %vm204_vm1 = vcmask (!%p138_p2), 1045504  }
   0x6   : > { %141 = sbr.rel (%p138_p2) target bundleno = 368 (0x170), region = 32  ;;  %441 = vmatprep.subr.bf16.mxu0 (!%p138_p2), %v488_v0  ;;  %v491_v11 = vld [vmem:[%s588_s1 + $0x18] sm:$0xff] (!%p138_p2)   ;;  %s502_s26 = smov (!%p138_p2), 32   ;;  %v492_v30 = vld [vmem:[%s588_s1 + $0x20] sm:$0xff] (!%p138_p2)   ;;  %v493_v32 = vld [vmem:[%s588_s1 + $0x28] sm:$0xff] (!%p138_p2)   ;;  %vm226_vm2 = vcmask (!%p138_p2), 261120  }
   0x7   : > { %442 = vmatpush3.bf16.msra.mxu0 (!%p138_p2), %v488_v0  ;;  %s503_s29 = smov (!%p138_p2), 64   ;;  %vm231_vm3 = vcmask (!%p138_p2), 523264   ;;  %vm293_vm4 = vcmask (!%p138_p2), 785408   ;;  %v421_v55 = vld [vmem:[%s589_s2] ss:$0 sm:$0xff] (!%p138_p2)  ;;  %vm353_vm5 = vcmask (!%p138_p2), 130048  }
   0x8   : > { %443 = vmatprep.subr.bf16.mxu0 (!%p138_p2), %v489_v1 }
   0xb   : > { %444 = vmatpush3.bf16.msra.mxu0 (!%p138_p2), %v489_v1 }
   0xc   : > { %445 = vmatprep.subr.bf16.mxu0 (!%p138_p2), %v490_v2 }
   0xd   : > { %s592_s13 = smov (!%p161_p3, %s413_s13), 1 }
   0xe   : > { %s457_s18 = smul.u32 40, %s592_s13  ;;  %s432_s7 = sshll.u32 %s592_s13, 5 }
   0xf   : > { %446 = vmatpush3.bf16.msra.mxu0 %v490_v2  ;;  %s170_s10 = scalar_lea.vmem %s590_s3, %s432_s7 }
  0x10   : > { %s165_s23 = scalar_lea.vmem %s587_s0, %s457_s18  ;;  %447 = vmatprep.subr.bf16.mxu0 %v491_v11 }
  0x11   : > { %v172_v3 = vld [vmem:[%s165_s23] sm:$0xff]  ;;  %v173_v4 = vld [vmem:[%s165_s23 + $0x8] sm:$0xff]  ;;  %v547_v5 = vld [vmem:[%s165_s23 + $0x10] sm:$0xff] }
  0x12   : > { %v183_v6 = vrot.slane %v172_v3, 1  ;;  %v184_v7 = vrot.slane %v173_v4, 1  ;;  %v186_v8 = vrot.slane %v547_v5, 1  ;;  %v205_v9 = vrot.slane %v172_v3, 2  ;;  %v175_v10 = vld [vmem:[%s165_s23 + $0x18] sm:$0xff] }
  0x13   : > { %v206_v12 = vrot.slane %v173_v4, 2  ;;  %v208_v13 = vrot.slane %v547_v5, 2  ;;  %v176_v14 = vld [vmem:[%s165_s23 + $0x20] sm:$0x3]  ;;  %v188_v15 = vrot.slane %v175_v10, 1  ;;  %v210_v16 = vrot.slane %v175_v10, 2  ;;  %448 = vmatpush3.bf16.msra.mxu0 %v491_v11 }
  0x14   : > { %v185_v17 = vsel %vm182_vm0, %v183_v6, %v184_v7  ;;  %v187_v18 = vsel %vm182_vm0, %v184_v7, %v186_v8  ;;  %v190_v19 = vrot.slane %v176_v14, 1  ;;  %v212_v20 = vrot.slane %v176_v14, 2  ;;  %449 = vmatprep.subr.bf16.mxu0 %v492_v30 }
  0x15   : > { %v468_v21 = vpack.i.bf16 %v187_v18, %v185_v17  ;;  %v207_v22 = vsel %vm204_vm1, %v205_v9, %v206_v12  ;;  %v209_v23 = vsel %vm204_vm1, %v206_v12, %v208_v13  ;;  %v189_v24 = vsel %vm182_vm0, %v186_v8, %v188_v15 }
  0x16   : > { %v478_v25 = vpack.i.bf16 %v209_v23, %v207_v22  ;;  %v191_v26 = vsel %vm182_vm0, %v188_v15, %v190_v19  ;;  %v211_v27 = vsel %vm204_vm1, %v208_v13, %v210_v16  ;;  %v213_v28 = vsel %vm204_vm1, %v210_v16, %v212_v20 }
  0x17   : > { %469 = vrot.lane.b32.xlu0 %v468_v21, %s502_s26  ;;  %v473_v29 = vpack.i.bf16 %v191_v26, %v189_v24  ;;  %v483_v31 = vpack.i.bf16 %v213_v28, %v211_v27  ;;  %450 = vmatpush3.bf16.msra.mxu0 %v492_v30 }
  0x18   : > { %479 = vrot.lane.b32.xlu1 %v478_v25, %s503_s29  ;;  %451 = vmatprep.subr.bf16.mxu0 %v493_v32 }
  0x1b   : > { %474 = vrot.lane.b32.xlu0 %v473_v29, %s502_s26  ;;  %452 = vmatpush3.bf16.msra.mxu0 %v493_v32 }
  0x1c   : > { %484 = vrot.lane.b32.xlu1 %v483_v31, %s503_s29 }
  0x89   : > { %v470_v33 = vpop.permute.xlu0 %469 }
  0x8a   : > { %v472_v34 = vunpack.i.h.bf16 %v470_v33  ;;  %v471_v35 = vunpack.i.l.bf16 %v470_v33  ;;  %v480_v36 = vpop.permute.xlu1 %479 }
  0x8b   : > { %v482_v37 = vunpack.i.h.bf16 %v480_v36  ;;  %v481_v38 = vunpack.i.l.bf16 %v480_v36 }
  0x8c   : > { %v227_v39 = vsel %vm226_vm2, %v172_v3, %v471_v35  ;;  %v228_v40 = vsel %vm226_vm2, %v173_v4, %v472_v34 }
  0x8d   : > { %v475_v41 = vpop.permute.xlu0 %474  ;;  %v232_v42 = vsel %vm231_vm3, %v227_v39, %v481_v38  ;;  %v233_v43 = vsel %vm231_vm3, %v228_v40, %v482_v37 }
  0x8e   : > { %v477_v44 = vunpack.i.h.bf16 %v475_v41  ;;  %v476_v45 = vunpack.i.l.bf16 %v475_v41  ;;  %v485_v46 = vpop.permute.xlu1 %484  ;;  %v236_v47 = vpack.c.bf16 %v233_v43, %v232_v42 }
  0x8f   : > { %v487_v48 = vunpack.i.h.bf16 %v485_v46  ;;  %v486_v49 = vunpack.i.l.bf16 %v485_v46 }
  0x90   : > { %v230_v50 = vsel %vm226_vm2, %v175_v10, %v477_v44  ;;  %v229_v51 = vsel %vm226_vm2, %v547_v5, %v476_v45  ;;  %453 = vmatprep.mubr.msk.bf16.mxu0 %vm293_vm4, %v236_v47 }
  0x91   : > { %v234_v52 = vsel %vm231_vm3, %v229_v51, %v486_v49  ;;  %v235_v53 = vsel %vm231_vm3, %v230_v50, %v487_v48 }
  0x92   : > { %v237_v54 = vpack.c.bf16 %v235_v53, %v234_v52 }
  0x94   : > { %454 = vmatmul.mubr.msk.bf16.vlgmr.msra.gmra.mrb[0].mxu0 %vm293_vm4, %v237_v54 }
 0x167   : > { %v455_v56 = vpop.f32.mrb[0].mxu0 }
 0x168   : > { %v343_v57 = vadd.f32 %v455_v56, %v421_v55  ;;  %v334_v58 = vpop.f32.mrb[1].mxu0 }
 0x169   : > { %v335_v59 = vadd.f32 %v421_v55, %v334_v58  ;;  %v456_v60 = vpop.f32.mrb[2].mxu0 }
 0x16a   : > { %v351_v61 = vmax.f32 %v343_v57, 0.0  ;;  %v346_v62 = vadd.f32 %v456_v60, %v421_v55  ;;  %v337_v63 = vpop.f32.mrb[3].mxu0 }
 0x16b   : > { %v349_v0 = vmax.f32 %v335_v59, 0.0  ;;  %v338_v1 = vadd.f32 %v421_v55, %v337_v63 }
 0x16c   : > { %356 = vst.msk [vmem:[%s170_s10 + $0x10] sm:$0xff] %vm353_vm5, %v351_v61  ;;  %v352_v2 = vmax.f32 %v346_v62, 0.0 }
 0x16d   : > { %354 = vst.msk [vmem:[%s170_s10] sm:$0xff] %vm353_vm5, %v349_v0  ;;  %v350_v3 = vmax.f32 %v338_v1, 0.0 }
 0x16e   : > { %357 = vst.msk [vmem:[%s170_s10 + $0x18] sm:$0xff] %vm353_vm5, %v352_v2 }
 0x16f   : > { %355 = vst.msk [vmem:[%s170_s10 + $0x8] sm:$0xff] %vm353_vm5, %v350_v3 }
 0x170 PF: > { %s13_s12 = sadd.s32 1, %s500_s12  }
 0x171   : > { %p10_p4 = scmp.ge.s32.totalorder %s13_s12, 4  }
 0x173   :  { %12 = sbr.rel (!%p10_p4) target bundleno = 1 (0x1), region = 62 }

// kernel: signal_decomposition_transformer.27
= control target key start
LH: loop header
LB: loop body
LE: loop exit
PB: predicated region body
PF: predicated region fallthrough
CT: control target
= control target key end

     0   :  { %8 = vsyncpa [#allocation3], 0  ;;  %s674_s0 = inlined_call_operand.vmem [shape: f32[2,34,16], index: 0, kind: input, shape index: {}]   ;;  %s675_s1 = inlined_call_operand.vmem [shape: bf16[2,48], index: 1, kind: input, shape index: {}]   ;;  %s676_s2 = inlined_call_operand.vmem [shape: f32[2,1], index: 2, kind: input, shape index: {}]   ;;  %s677_s3 = inlined_call_operand.hbm [shape: f32[2,2,32], index: 3, kind: output, shape index: {}]  }
   0x1   :  { %10 = vsyncpa [#allocation3 + $0x1], 0  ;;  %s546_s12 = smov 0   ;;  %s548_s13 = smov 0  }
   0x2   :  { %s550_s14 = smov 0   ;;  %s552_s15 = smov 0  }
   0x3 LB: > { %s567_s16 = sadd.s32 4294967295, %s518_s15   ;;  %s368_s17 = sadd.s32 4294967294, %s518_s15   ;;  %s518_s15 = sphi %s552_s15, %s683_s15   ;;  %s514_s14 = sphi %s550_s14, %s682_s14   ;;  %s510_s13 = sphi %s548_s13, %s681_s13   ;;  %s506_s12 = sphi %s546_s12, %s680_s12  }
   0x4   : > { %s571_s18 = sadd.s32 1, %s518_s15   ;;  %s91_s19 = sadd.s32 1, %s514_s14 }
   0x5   : > { %s88_s20 = ssub.s32 %s518_s15, %s571_s18  ;;  %p101_p0 = scmp.ne.s32.totalorder %s514_s14, %s510_s13 }
   0x6   : > { %p89_p1 = scmp.eq.s32.totalorder %s88_s20, 0  ;;  %p102_p2 = scmp.eq.s32.totalorder %s567_s16, 1 }
   0x7   : > { %p107_p3 = scmp.ne.s32.totalorder %s510_s13, %s506_s12  ;;  %p108_p4 = scmp.eq.s32.totalorder %s368_s17, 1 }
   0x8   : > { %s582_s21 = scalar_select %p89_p1, %s514_s14, %s91_s19  }
   0x9   : > { %p584_p5 = por %p102_p2, %p101_p0  ;;  %p588_p6 = por %p108_p4, %p107_p3 }
   0xa   : > { %p371_p7 = scmp.ge.s32.totalorder %s518_s15, 1  ;;  %p140_p8 = scmp.lt.s32.totalorder %s518_s15, 3 }
   0xc   : > { %p141_p9 = pnand %p371_p7, %p140_p8 }
   0xd   : > { %p164_p10 = scmp.lt.s32.totalorder (!%p141_p9), %s567_s16, 1  ;;  %vm180_vm0 = vcmask (!%p141_p9), 1046528   ;;  %vm202_vm1 = vcmask (!%p141_p9), 1045504   ;;  %v520_v3 = vmov (!%p141_p9), 0.0   ;;  %s521_s29 = smov (!%p141_p9), 16   ;;  %vm523_vm2 = vmmov (!%p141_p9), 0  }
   0xe   : > { %144 = sbr.rel (%p141_p9) target bundleno = 400 (0x190), region = 32  ;;  %382 = vmatprep.subr.bf16.mxu0 (!%p141_p9), %v520_v3  ;;  %s522_s30 = smov (!%p141_p9), 32   ;;  %386 = vmatprep.mubr.msk.bf16.mxu0 (!%p141_p9), %vm523_vm2, %v520_v3  ;;  %v237_v28 = vld [vmem:[%s676_s2] sm:$0x3] (!%p141_p9)  ;;  %v524_v29 = vmov (!%p141_p9), 0   ;;  %vm224_vm3 = vcmask (!%p141_p9), 130048  }
   0xf   : > { %455 = vset.pattern.permute.xlu0 (!%p141_p9), %v524_v29  ;;  %vm229_vm4 = vcmask (!%p141_p9), 261120   ;;  %vm243_vm5 = vcmask (!%p141_p9), 392192   ;;  %v236_v54 = vld [vmem:[%s675_s1] sm:$0x1] (!%p141_p9)  ;;  %s161_s8 = sand.u32 (!%p141_p9), 1, %s510_s13   ;;  %s376_s10 = sshll.u32 (!%p141_p9), %s567_s16, 5 }
  0x10   : > { %s372_s9 = sshll.u32 (!%p141_p9), %s161_s8, 1  ;;  %vm293_vm6 = vcmask (!%p141_p9), 254976   ;;  %s525_s26 = smov (!%p141_p9), [#allocation2]  }
  0x11   : > { %s163_s11 = scalar_lea.vmem (!%p141_p9), [#allocation2], %s372_s9  ;;  %s460_s27 = sshll.u32 (!%p141_p9), %s525_s26, 4  ;;  %s461_s27 = int_to_ptr.vmem [resolvable:$false] %s460_s27 }
  0x12   : > { %s309_s17 = sshll.u32 (!%p141_p9), %s163_s11, 4  ;;  %s634_s17 = int_to_ptr.vmem [resolvable:$true] %s309_s17 }
  0x13   : > { %p463_p0 = scmp.lt.s32.totalorder (!%p141_p9), %s634_s17, %s461_s27 }
  0x15   : > { %s165_s24 = scalar_select %p164_p10, %s567_s16, 1 }
  0x16   : > { %s296_s16 = scalar_lea.sflag [#allocation3], %s161_s8 }
  0x17   : > { %s390_s25 = smul.u32 40, %s165_s24  ;;  %s632_s24 = scalar_lea.hbm %s677_s3, %s376_s10 }
  0x19   : > { %s168_s28 = scalar_lea.vmem %s674_s0, %s390_s25  ;;  %s456_s25 = scalar_lea.vmem %s634_s17, 32 }
  0x1a   : > { %v170_v0 = vld [vmem:[%s168_s28] sm:$0xff]  ;;  %v171_v1 = vld [vmem:[%s168_s28 + $0x8] sm:$0xff]  ;;  %v172_v2 = vld [vmem:[%s168_s28 + $0x10] sm:$0xff]  ;;  %p457_p11 = scmp.ne.s32.totalorder %s634_s17, %s456_s25 }
  0x1b   : > { %v181_v4 = vrot.slane %v170_v0, 1  ;;  %v182_v5 = vrot.slane %v171_v1, 1  ;;  %v184_v6 = vrot.slane %v172_v2, 1  ;;  %v203_v7 = vrot.slane %v170_v0, 2  ;;  %v173_v8 = vld [vmem:[%s168_s28 + $0x18] sm:$0xff] }
  0x1c   : > { %v204_v9 = vrot.slane %v171_v1, 2  ;;  %v206_v10 = vrot.slane %v172_v2, 2  ;;  %v174_v11 = vld [vmem:[%s168_s28 + $0x20] sm:$0x3]  ;;  %v186_v12 = vrot.slane %v173_v8, 1  ;;  %v208_v13 = vrot.slane %v173_v8, 2  ;;  %p458_p12 = pnand %p457_p11, %p584_p5 }
  0x1d   : > { %v183_v14 = vsel %vm180_vm0, %v181_v4, %v182_v5  ;;  %v185_v15 = vsel %vm180_vm0, %v182_v5, %v184_v6  ;;  %v188_v16 = vrot.slane %v174_v11, 1  ;;  %v210_v17 = vrot.slane %v174_v11, 2  ;;  %s462_s28 = scalar_lea.vmem %s461_s27, 64 }
  0x1e   : > { %v435_v18 = vpack.i.bf16 %v185_v15, %v183_v14  ;;  %v205_v19 = vsel %vm202_vm1, %v203_v7, %v204_v9  ;;  %v207_v20 = vsel %vm202_vm1, %v204_v9, %v206_v10  ;;  %v187_v21 = vsel %vm180_vm0, %v184_v6, %v186_v12  ;;  %p459_p13 = pneg %p458_p12  ;;  %p464_p1 = scmp.lt.s32.totalorder %s462_s28, %s456_s25 }
  0x1f   : > { %v189_v22 = vsel %vm180_vm0, %v186_v12, %v188_v16  ;;  %v209_v23 = vsel %vm202_vm1, %v206_v10, %v208_v13  ;;  %v211_v24 = vsel %vm202_vm1, %v208_v13, %v210_v17  ;;  %v440_v25 = vpack.i.bf16 %v207_v20, %v205_v19 }
  0x20   : > { %436 = vrot.lane.b32.xlu0 %v435_v18, %s521_s29  ;;  %v445_v26 = vpack.i.bf16 %v189_v22, %v187_v21  ;;  %v450_v27 = vpack.i.bf16 %v211_v24, %v209_v23  ;;  %p465_p2 = por %p464_p1, %p463_p0 }
  0x22   : > { %446 = vrot.lane.b32.xlu1 %v445_v26, %s521_s29  ;;  %p466_p3 = pnand %p465_p2, %p459_p13 }
  0x24   : > { %441 = vrot.lane.b32.xlu0 %v440_v25, %s522_s30 }
  0x26   : > { %451 = vrot.lane.b32.xlu1 %v450_v27, %s522_s30 }
  0x28   : > { %240 = vperm.xlu0 %455, %v237_v28  }
  0x92   : > { %v437_v30 = vpop.permute.xlu0 %436 }
  0x93   : > { %v439_v31 = vunpack.i.h.bf16 %v437_v30  ;;  %v438_v32 = vunpack.i.l.bf16 %v437_v30 }
  0x94   : > { %v447_v33 = vpop.permute.xlu1 %446 }
  0x95   : > { %v449_v35 = vunpack.i.h.bf16 %v447_v33  ;;  %v448_v36 = vunpack.i.l.bf16 %v447_v33  ;;  %v225_v40 = vsel %vm224_vm3, %v170_v0, %v438_v32  ;;  %v226_v41 = vsel %vm224_vm3, %v171_v1, %v439_v31 }
  0x96   : > { %v442_v34 = vpop.permute.xlu0 %441 }
  0x97   : > { %v444_v37 = vunpack.i.h.bf16 %v442_v34  ;;  %v443_v38 = vunpack.i.l.bf16 %v442_v34  ;;  %v228_v46 = vsel %vm224_vm3, %v173_v8, %v449_v35  ;;  %v227_v47 = vsel %vm224_vm3, %v172_v2, %v448_v36 }
  0x98   : > { %v452_v39 = vpop.permute.xlu1 %451 }
  0x99   : > { %v454_v42 = vunpack.i.h.bf16 %v452_v39  ;;  %v453_v43 = vunpack.i.l.bf16 %v452_v39  ;;  %v230_v44 = vsel %vm229_vm4, %v225_v40, %v443_v38  ;;  %v231_v45 = vsel %vm229_vm4, %v226_v41, %v444_v37 }
  0x9a   : > { %v234_v48 = vpack.c.bf16 %v231_v45, %v230_v44 }
  0x9b   : > { %v232_v50 = vsel %vm229_vm4, %v227_v47, %v453_v43  ;;  %v233_v51 = vsel %vm229_vm4, %v228_v46, %v454_v42 }
  0x9c   : > { %v248_v49 = vsel %vm243_vm5, %v234_v48, 0  ;;  %v235_v52 = vpack.c.bf16 %v233_v51, %v232_v50 }
  0x9d   : > { %383 = vmatpush3.bf16.xpose.msra.mxu0 %v248_v49 }
  0x9e   : > { %384 = vmatprep.subr.bf16.mxu0 %v520_v3  ;;  %v251_v53 = vsel %vm243_vm5, %v235_v52, 0 }
  0xa5   : > { %385 = vmatpush3.bf16.xpose.msra.mxu0 %v251_v53 }
  0xa7   : > { %v241_v55 = vpop.permute.xlu0 %240 }
  0xac   : > { %387 = vmatmul.mubr.msk.bf16.vlgmr.msra.gmra.mrb[0].mxu0 %vm243_vm5, %v236_v54 }
 0x17f   : > { %v287_v56 = vpop.f32.mrb[0].mxu0 }
 0x180   : > { %v288_v57 = vadd.f32 %v287_v56, %v241_v55  ;;  %v388_v58 = vpop.f32.mrb[1].mxu0 }
 0x181   : > { %v290_v59 = vpop.f32.mrb[2].mxu0 }
 0x182   : > { %v389_v60 = vpop.f32.mrb[3].mxu0  ;;  %294 = vst.msk [vmem:[%s163_s11] sm:$0x3] %vm293_vm6, %v288_v57 }
 0x183   : > { %469 = shalt.err (!%p466_p3)
}
 0x184   : > { %s470_s29 = scalar_lea.hbm %s632_s24, 32  ;;  %s474_s5 = scalar_lea.hbm %s677_s3, 64 }
 0x185   : > { %p471_p4 = scmp.ne.s32.totalorder %s632_s24, %s470_s29  ;;  %p475_p9 = scmp.lt.u32.totalorder %s632_s24, %s677_s3 }
 0x186   : > { %p476_p10 = scmp.lt.u32.totalorder %s474_s5, %s470_s29  ;;  %p478_p12 = scmp.lt.u32.totalorder %s470_s29, %s632_s24 }
 0x187   : > { %p472_p7 = pnand %p471_p4, %p584_p5 }
 0x188   : > { %p477_p11 = por %p476_p10, %p475_p9 }
 0x189   : > { %p473_p8 = pneg %p472_p7 }
 0x18a   : > { %p479_p13 = por %p478_p12, %p477_p11 }
 0x18c   : > { %p480_p0 = pnand %p479_p13, %p473_p8 }
 0x18e   : > { %483 = shalt.err (!%p480_p0)
}
 0x18f   : > { %391 = dma.vmem_to_hbm [thread:$0]  (%p584_p5), %s634_s17, 32, %s632_s24, %s296_s16  }
 0x190 PF: > { %p397_p1 = scmp.ge.s32.totalorder %s518_s15, 2  ;;  %s321_s8 = sand.u32 1, %s506_s12  }
 0x191   : > { %s322_s9 = scalar_lea.sflag [#allocation3], %s321_s8 }
 0x192   : > { %p394_p2 = pnand %p397_p1, %p588_p6 }
 0x194   : > { %501 = dma.done.wait (!%p394_p2), %s322_s9, 32  }
 0x195   : > { %503 = vsyncadd (!%p394_p2), %s322_s9, 4294967264  ;;  %p13_p3 = scmp.ge.s32.totalorder %s571_s18, 4   ;;  %s680_s12 = smov %s510_s13 }
 0x196   : > { %s681_s13 = smov %s514_s14  ;;  %s682_s14 = smov %s582_s21 }
 0x197   : > { %s683_s15 = smov %s571_s18  ;;  %15 = sbr.rel (!%p13_p3) target bundleno = 3 (0x3), region = 67 }
 0x19e   :  { %327 = vsyncpa [#allocation3], 1 }
 0x19f   :  { %329 = vsyncpa [#allocation3 + $0x1], 1 }

</bundles_post_ra>
